<compile_context>
chip_gen: v5e
topology: v5e:2x2
jax: 0.10.0
libtpu: 0.0.40
codegen_flags: <defaults>
</compile_context>

<pallas_src>
import functools

import jax
import jax.numpy as jnp
import numpy as np
from jax import lax
from jax.experimental import pallas as pl
from jax.experimental.pallas import tpu as pltpu

NUM_IMG = 3  # rend_three_views=True -> 3 orthographic box views


def _round_up(x, m):
    return ((x + m - 1) // m) * m


def _render_splat_kernel(featT_ref, pcn_ref, out_ref, acc_ref, *,
                         img_size, srow, wlane, cpad, cnt_row):
    """One grid step: one batch element x one P tile, all three views.

    featT_ref: (1, Cpad, Pt)            f32; rows = [pcn(3), img_feat(F), ones, 0-pad]
    pcn_ref:   (1, Pt, 3)               f32 normalized point cloud (column-index layout)
    out_ref:   (1, 3*Cpad, Srow, Wlane) bf16; resident across the P grid axis
    acc_ref:   (3, Cpad*Srow, Wlane)    f32 VMEM accumulator scratch
    """
    s = img_size
    p_idx = pl.program_id(1)

    @pl.when(p_idx == 0)
    def _init():
        acc_ref[...] = jnp.zeros_like(acc_ref)

    featT = featT_ref[0]                       # (Cpad, Pt) f32, lane-dense in P
    pcn = pcn_ref[0]                           # (Pt, 3)    f32

    def pix(c):                                # -> int32 pixel index, same shape
        return jnp.clip(jnp.floor((c + 1.0) * (0.5 * s)), 0, s - 1).astype(jnp.int32)

    # Row-axis indices in (1, Pt) layout (read straight from the lane-dense
    # featT rows) and column-axis indices in (Pt, 1) layout (from pcn).
    xi_row = pix(featT[0:1, :])                # (1, Pt)
    yi_row = pix(featT[1:2, :])                # (1, Pt)
    yi_col = pix(pcn[:, 1:2])                  # (Pt, 1)
    zi_col = pix(pcn[:, 2:3])                  # (Pt, 1)

    # Separable per-axis one-hots: ~4*Pt*S compares instead of Pt*3*S^2.
    iota_r = lax.broadcasted_iota(jnp.int32, (srow, 1), 0)     # (Srow, 1)
    iota_c = lax.broadcasted_iota(jnp.int32, (1, wlane), 1)    # (1, Wlane)
    oxT = (iota_r == xi_row).astype(jnp.bfloat16)              # (Srow, Pt)  rows: views 0,1
    oyT = (iota_r == yi_row).astype(jnp.bfloat16)              # (Srow, Pt)  rows: view 2
    oy_c = (yi_col == iota_c).astype(jnp.bfloat16)             # (Pt, Wlane) cols: view 0
    oz_c = (zi_col == iota_c).astype(jnp.bfloat16)             # (Pt, Wlane) cols: views 1,2

    featT_b = featT.astype(jnp.bfloat16)                       # (Cpad, Pt)
    pt = featT_b.shape[-1]
    # Lane-dense MXU LHS: channels x image-rows stacked into the M axis.
    lhs_x = (featT_b[:, None, :] * oxT[None, :, :]).reshape(cpad * srow, pt)
    lhs_y = (featT_b[:, None, :] * oyT[None, :, :]).reshape(cpad * srow, pt)

    # view0 = (x, y), view1 = (x, z), view2 = (y, z); f32 accumulation.
    acc_ref[0] = acc_ref[0] + jnp.dot(lhs_x, oy_c, preferred_element_type=jnp.float32)
    acc_ref[1] = acc_ref[1] + jnp.dot(lhs_x, oz_c, preferred_element_type=jnp.float32)
    acc_ref[2] = acc_ref[2] + jnp.dot(lhs_y, oz_c, preferred_element_type=jnp.float32)

    @pl.when(p_idx == pl.num_programs(1) - 1)
    def _finalize():
        acc = acc_ref[...].reshape(NUM_IMG, cpad, srow, wlane)
        cnt = acc[:, cnt_row:cnt_row + 1]                       # (3, 1, Srow, Wlane)
        inv = pl.reciprocal(jnp.maximum(cnt, 1.0), approx=True)  # EUP slot
        img = acc * inv
        out_ref[0] = img.reshape(NUM_IMG * cpad, srow, wlane).astype(out_ref.dtype)


def _pick_p_tile(num_points, max_tile=2048):
    """P tile: lane-aligned (multiple of 128), capped so the per-step working
    set (one-hots + bf16 LHS + f32 accumulator) stays well inside VMEM on all
    generations (v7x: 64 MiB physical)."""
    if num_points <= max_tile:
        return _round_up(max(num_points, 1), 128)
    return max_tile


def render_images(pc, img_feat, img_size, out_dtype=jnp.bfloat16):
    """pc: (bs, P, 3), img_feat: (bs, P, F) -> (bs, NUM_IMG, 3+F, H, W)."""
    bs, num_points, _ = pc.shape
    feat_dim = img_feat.shape[-1]
    c_real = 3 + feat_dim
    cnt_row = c_real                          # fused point-count channel
    cpad = _round_up(c_real + 1, 8)
    s = img_size
    srow = _round_up(s, 16)                   # H padded (bf16 sublane friendly)
    wlane = _round_up(s, 128)                 # W padded to lane-dense stores

    pc = pc.astype(jnp.float32)
    img_feat = img_feat.astype(jnp.float32)

    # norm_corr: per-element max |pc|, hoisted out of the kernel so P tiling
    # sees the *global* maximum (and it is computed once, not once per tile).
    max_pc = jnp.maximum(jnp.max(jnp.abs(pc), axis=(1, 2), keepdims=True), 1e-8)
    pcn = pc / max_pc                                            # (bs, P, 3)

    # Feature rows in (bs, Cpad, P) layout: channels on sublanes, points on
    # lanes (wrapper-side layout plumbing, not compute hoisting).
    ones = jnp.ones((bs, num_points, 1), jnp.float32)
    feat_all = jnp.concatenate([pcn, img_feat, ones], axis=-1)   # (bs, P, C+1)
    featT = jnp.transpose(feat_all, (0, 2, 1))                   # (bs, C+1, P)
    if cpad > c_real + 1:
        featT = jnp.pad(featT, ((0, 0), (0, cpad - c_real - 1), (0, 0)))

    p_tile = _pick_p_tile(num_points)
    p_pad = _round_up(num_points, p_tile)
    if p_pad > num_points:
        # Padding points have all-zero feature rows (incl. the "ones" count
        # row), so they contribute nothing to any pixel.
        featT = jnp.pad(featT, ((0, 0), (0, 0), (0, p_pad - num_points)))
        pcn = jnp.pad(pcn, ((0, 0), (0, p_pad - num_points), (0, 0)))
    n_p = p_pad // p_tile

    kernel = functools.partial(_render_splat_kernel, img_size=s, srow=srow,
                               wlane=wlane, cpad=cpad, cnt_row=cnt_row)

    flops = 2 * bs * NUM_IMG * (cpad * srow) * p_pad * wlane
    bytes_accessed = (featT.size + pcn.size) * 4 \
        + bs * NUM_IMG * cpad * srow * wlane * 2

    out = pl.pallas_call(
        kernel,
        out_shape=jax.ShapeDtypeStruct((bs, NUM_IMG * cpad, srow, wlane),
                                       out_dtype),
        grid=(bs, n_p),
        in_specs=[
            pl.BlockSpec((1, cpad, p_tile), lambda b, p: (b, 0, p)),
            pl.BlockSpec((1, p_tile, 3), lambda b, p: (b, p, 0)),
        ],
        out_specs=pl.BlockSpec((1, NUM_IMG * cpad, srow, wlane),
                               lambda b, p: (b, 0, 0, 0)),
        scratch_shapes=[pltpu.VMEM((NUM_IMG, cpad * srow, wlane), jnp.float32)],
        compiler_params=pltpu.CompilerParams(
            dimension_semantics=("parallel", "arbitrary"),
            vmem_limit_bytes=48 * 1024 * 1024),
        cost_estimate=pl.CostEstimate(flops=int(flops), transcendentals=0,
                                      bytes_accessed=int(bytes_accessed)),
    )(featT, pcn)

    # Cheap slice/reshape only (no post-kernel transpose): (bs, V, C, H, W).
    out = out.reshape(bs, NUM_IMG, cpad, srow, wlane)
    return out[:, :, :c_real, :s, :s]


def _render_images_ref(pc, img_feat, img_size):
    """Pure-JAX f32 reference of the same average splat (correctness check)."""
    bs, P, _ = pc.shape
    F = img_feat.shape[-1]
    s = img_size
    max_pc = jnp.maximum(jnp.max(jnp.abs(pc), axis=(1, 2), keepdims=True), 1e-8)
    pcn = pc / max_pc
    feat_all = jnp.concatenate([pcn, img_feat], axis=-1)        # (bs, P, C)

    def pix(c):
        return jnp.clip(jnp.floor((c + 1.0) * 0.5 * s), 0, s - 1).astype(jnp.int32)

    xi, yi, zi = pix(pcn[..., 0]), pix(pcn[..., 1]), pix(pcn[..., 2])
    idx = jnp.stack([xi * s + yi, xi * s + zi, yi * s + zi], axis=1)   # (bs,3,P)
    onehot = jax.nn.one_hot(idx, s * s, dtype=jnp.float32)      # (bs, 3, P, HW)
    num = jnp.einsum('bpc,bvph->bvch', feat_all, onehot)
    cnt = jnp.einsum('bvph->bvh', onehot)[:, :, None, :]
    img = num / jnp.maximum(cnt, 1.0)
    return img.reshape(bs, NUM_IMG, 3 + F, s, s)


class MVTPallas:
    """JAX/Pallas re-implementation of the render portion of MVT.forward."""

    def __init__(self, img_size=16, img_feat_dim=3, add_corr=True,
                 norm_corr=True, add_pixel_loc=True):
        self.img_size = img_size
        self.img_feat_dim = img_feat_dim
        self.add_corr = add_corr
        self.norm_corr = norm_corr
        self.add_pixel_loc = add_pixel_loc
        self.num_img = NUM_IMG
        self.img = None  # mirrors `mvt.img` side-output in the PyTorch code

        # pixel_loc buffer (deterministic, as in MVTSingle.__init__)
        s = img_size
        ploc = jnp.zeros((NUM_IMG, 3, s, s), jnp.float32)
        ploc = ploc.at[:, 0].set(jnp.linspace(-1.0, 1.0, NUM_IMG)[:, None, None])
        ploc = ploc.at[:, 1].set(jnp.linspace(-1.0, 1.0, s)[None, :, None])
        ploc = ploc.at[:, 2].set(jnp.linspace(-1.0, 1.0, s)[None, None, :])
        self.pixel_loc = ploc

    def render(self, pc, img_feat, img_aug):
        bs = pc.shape[0]
        img = render_images(pc, img_feat, self.img_size)   # (bs, V, C, H, W)

        # mvt.img = img[:, :, 3:] when add_corr, else full image
        self.img = img[:, :, 3:] if self.add_corr else img

        if img_aug != 0:
            # TODO(synk): training-only noise; fixed key mirrors nothing in the
            # reference (torch.rand is stateful) -- behavioral placeholder only.
            k1, k2 = jax.random.split(jax.random.PRNGKey(1))
            stdv = img_aug * jax.random.uniform(k1, (1,))
            noise = (stdv * (2.0 * jax.random.uniform(k2, img.shape) - 1.0))
            img = jnp.clip(img + noise.astype(img.dtype), -1.0, 1.0)

        if self.add_pixel_loc:
            ploc = jnp.broadcast_to(self.pixel_loc[None],
                                    (bs,) + self.pixel_loc.shape)
            img = jnp.concatenate([img, ploc.astype(img.dtype)], axis=2)
        return img

    def forward(self, pc, img_feat, img_aug=0, wpt_local=None,
                rot_x_y=None, language_goal=None):
        # verify_inp (eval-mode path: img_aug must be 0, shapes must match)
        assert pc.shape[0] == img_feat.shape[0]
        assert pc.shape[-1] == 3
        assert img_feat.shape[-1] == self.img_feat_dim
        assert pc.shape[1] == img_feat.shape[1]

        img = self.render(pc, img_feat, img_aug)

        out = {}
        # TODO(synk): self.mvt1(img=..., forward_no_feat=True) omitted --
        # MVTSingle source not provided; stage_two branch likewise omitted.
        out["mvt1_ori_img"] = img
        return out


if __name__ == "__main__":
    bs, num_points, img_feat_dim, img_size = 2, 128, 3, 16

    key = jax.random.PRNGKey(0)
    k_pc, k_feat = jax.random.split(key)
    pc = jax.random.uniform(k_pc, (bs, num_points, 3),
                            minval=-1.0, maxval=1.0, dtype=jnp.float32)
    img_feat = jax.random.uniform(k_feat, (bs, num_points, img_feat_dim),
                                  dtype=jnp.float32)

    mvt = MVTPallas(img_size=img_size, img_feat_dim=img_feat_dim)
    out = mvt.forward(pc, img_feat, img_aug=0)

    img = jax.block_until_ready(out["mvt1_ori_img"])
    assert img.shape == (bs, NUM_IMG, 3 + img_feat_dim + 3, img_size, img_size)
    assert jax.block_until_ready(mvt.img).shape == (
        bs, NUM_IMG, img_feat_dim, img_size, img_size)

    # correctness check vs. pure-JAX f32 reference (bf16 MXU path + bf16 output
    # + approx reciprocal introduce <1% error; tolerance chosen accordingly)
    ref = jax.block_until_ready(_render_images_ref(pc, img_feat, img_size))
    got = np.asarray(jnp.asarray(img[:, :, :3 + img_feat_dim], jnp.float32))
    np.testing.assert_allclose(got, np.asarray(ref), rtol=3e-2, atol=3e-2)

    print("KERNEL_OK")
</pallas_src>

<mosaic_0001>
module attributes {stable_mosaic.version = 11 : i64} {
  func.func @_render_splat_kernel(%arg0: i32, %arg1: i32, %arg2: memref<1x8x128xf32, #tpu.memory_space<vmem>>, %arg3: memref<1x128x3xf32, #tpu.memory_space<vmem>>, %arg4: memref<1x24x16x128xbf16, #tpu.memory_space<vmem>>, %arg5: memref<3x128x128xf32, #tpu.memory_space<vmem>>) attributes {dimension_semantics = [#tpu.dimension_semantics<parallel>, #tpu.dimension_semantics<arbitrary>], iteration_bounds = array<i64: 2, 1>, scalar_prefetch = 0 : i64, scratch_operands = 1 : i64, tpu.core_type = #tpu.core_type<tc>, window_params = [{transform_indices = @transform_0, window_bounds = array<i64: 1, 8, 128>}, {transform_indices = @transform_1, window_bounds = array<i64: 1, 128, 3>}, {transform_indices = @transform_2, window_bounds = array<i64: 1, 24, 16, 128>}]} {
    %c0_i32 = arith.constant 0 : i32
    %0 = arith.cmpi eq, %arg1, %c0_i32 : i32
    %1 = arith.extui %0 : i1 to i32
    %c0_i32_0 = arith.constant 0 : i32
    %2 = arith.cmpi ne, %1, %c0_i32_0 : i32
    scf.if %2 {
      %cst_41 = arith.constant 0.000000e+00 : f32
      %122 = vector.broadcast %cst_41 : f32 to vector<3x128x128xf32>
      %c0_42 = arith.constant 0 : index
      %c0_43 = arith.constant 0 : index
      %c0_44 = arith.constant 0 : index
      %123 = vector.load %arg5[%c0_42, %c0_43, %c0_44] : memref<3x128x128xf32, #tpu.memory_space<vmem>>, vector<3x128x128xf32>
      tpu.vector_store %arg5[%c0_42, %c0_43, %c0_44], %122 {strides = array<i32>} : memref<3x128x128xf32, #tpu.memory_space<vmem>>, vector<3x128x128xf32>,
    } else {
    }
    %c0 = arith.constant 0 : index
    %c0_1 = arith.constant 0 : index
    %c0_2 = arith.constant 0 : index
    %3 = vector.load %arg2[%c0, %c0_1, %c0_2] : memref<1x8x128xf32, #tpu.memory_space<vmem>>, vector<1x8x128xf32>
    %4 = vector.shape_cast %3 : vector<1x8x128xf32> to vector<8x128xf32>
    %c0_3 = arith.constant 0 : index
    %c0_4 = arith.constant 0 : index
    %c0_5 = arith.constant 0 : index
    %5 = vector.load %arg3[%c0_3, %c0_4, %c0_5] : memref<1x128x3xf32, #tpu.memory_space<vmem>>, vector<1x128x3xf32>
    %6 = vector.shape_cast %5 : vector<1x128x3xf32> to vector<128x3xf32>
    %7 = vector.extract_strided_slice %4 {offsets = [0, 0], sizes = [1, 128], strides = [1, 1]} : vector<8x128xf32> to vector<1x128xf32>
    %cst = arith.constant 1.000000e+00 : f32
    %8 = vector.broadcast %cst : f32 to vector<1x128xf32>
    %9 = arith.addf %7, %8 : vector<1x128xf32>
    %cst_6 = arith.constant 8.000000e+00 : f32
    %10 = vector.broadcast %cst_6 : f32 to vector<1x128xf32>
    %11 = arith.mulf %9, %10 : vector<1x128xf32>
    %12 = math.floor %11 : vector<1x128xf32>
    %c0_i32_7 = arith.constant 0 : i32
    %c15_i32 = arith.constant 15 : i32
    %13 = arith.sitofp %c0_i32_7 : i32 to f32
    %14 = vector.broadcast %13 : f32 to vector<1x128xf32>
    %15 = arith.maximumf %14, %12 : vector<1x128xf32>
    %16 = arith.sitofp %c15_i32 : i32 to f32
    %17 = vector.broadcast %16 : f32 to vector<1x128xf32>
    %18 = arith.minimumf %17, %15 : vector<1x128xf32>
    %19 = arith.fptosi %18 : vector<1x128xf32> to vector<1x128xi32>
    %20 = vector.extract_strided_slice %4 {offsets = [1, 0], sizes = [1, 128], strides = [1, 1]} : vector<8x128xf32> to vector<1x128xf32>
    %cst_8 = arith.constant 1.000000e+00 : f32
    %21 = vector.broadcast %cst_8 : f32 to vector<1x128xf32>
    %22 = arith.addf %20, %21 : vector<1x128xf32>
    %cst_9 = arith.constant 8.000000e+00 : f32
    %23 = vector.broadcast %cst_9 : f32 to vector<1x128xf32>
    %24 = arith.mulf %22, %23 : vector<1x128xf32>
    %25 = math.floor %24 : vector<1x128xf32>
    %c0_i32_10 = arith.constant 0 : i32
    %c15_i32_11 = arith.constant 15 : i32
    %26 = arith.sitofp %c0_i32_10 : i32 to f32
    %27 = vector.broadcast %26 : f32 to vector<1x128xf32>
    %28 = arith.maximumf %27, %25 : vector<1x128xf32>
    %29 = arith.sitofp %c15_i32_11 : i32 to f32
    %30 = vector.broadcast %29 : f32 to vector<1x128xf32>
    %31 = arith.minimumf %30, %28 : vector<1x128xf32>
    %32 = arith.fptosi %31 : vector<1x128xf32> to vector<1x128xi32>
    %33 = vector.extract_strided_slice %6 {offsets = [0, 1], sizes = [128, 1], strides = [1, 1]} : vector<128x3xf32> to vector<128x1xf32>
    %cst_12 = arith.constant 1.000000e+00 : f32
    %34 = vector.broadcast %cst_12 : f32 to vector<128x1xf32>
    %35 = arith.addf %33, %34 : vector<128x1xf32>
    %cst_13 = arith.constant 8.000000e+00 : f32
    %36 = vector.broadcast %cst_13 : f32 to vector<128x1xf32>
    %37 = arith.mulf %35, %36 : vector<128x1xf32>
    %38 = math.floor %37 : vector<128x1xf32>
    %c0_i32_14 = arith.constant 0 : i32
    %c15_i32_15 = arith.constant 15 : i32
    %39 = arith.sitofp %c0_i32_14 : i32 to f32
    %40 = vector.broadcast %39 : f32 to vector<128x1xf32>
    %41 = arith.maximumf %40, %38 : vector<128x1xf32>
    %42 = arith.sitofp %c15_i32_15 : i32 to f32
    %43 = vector.broadcast %42 : f32 to vector<128x1xf32>
    %44 = arith.minimumf %43, %41 : vector<128x1xf32>
    %45 = arith.fptosi %44 : vector<128x1xf32> to vector<128x1xi32>
    %46 = vector.extract_strided_slice %6 {offsets = [0, 2], sizes = [128, 1], strides = [1, 1]} : vector<128x3xf32> to vector<128x1xf32>
    %cst_16 = arith.constant 1.000000e+00 : f32
    %47 = vector.broadcast %cst_16 : f32 to vector<128x1xf32>
    %48 = arith.addf %46, %47 : vector<128x1xf32>
    %cst_17 = arith.constant 8.000000e+00 : f32
    %49 = vector.broadcast %cst_17 : f32 to vector<128x1xf32>
    %50 = arith.mulf %48, %49 : vector<128x1xf32>
    %51 = math.floor %50 : vector<128x1xf32>
    %c0_i32_18 = arith.constant 0 : i32
    %c15_i32_19 = arith.constant 15 : i32
    %52 = arith.sitofp %c0_i32_18 : i32 to f32
    %53 = vector.broadcast %52 : f32 to vector<128x1xf32>
    %54 = arith.maximumf %53, %51 : vector<128x1xf32>
    %55 = arith.sitofp %c15_i32_19 : i32 to f32
    %56 = vector.broadcast %55 : f32 to vector<128x1xf32>
    %57 = arith.minimumf %56, %54 : vector<128x1xf32>
    %58 = arith.fptosi %57 : vector<128x1xf32> to vector<128x1xi32>
    %59 = tpu.iota {dimensions = array<i32: 0>} : vector<16x1xi32>
    %60 = tpu.iota {dimensions = array<i32: 1>} : vector<1x128xi32>
    %61 = vector.broadcast %59 : vector<16x1xi32> to vector<16x128xi32>
    %62 = vector.broadcast %19 : vector<1x128xi32> to vector<16x128xi32>
    %63 = arith.cmpi eq, %61, %62 : vector<16x128xi32>
    %64 = arith.extui %63 : vector<16x128xi1> to vector<16x128xi32>
    %65 = arith.sitofp %64 : vector<16x128xi32> to vector<16x128xf32>
    %66 = arith.truncf %65 : vector<16x128xf32> to vector<16x128xbf16>
    %67 = vector.broadcast %59 : vector<16x1xi32> to vector<16x128xi32>
    %68 = vector.broadcast %32 : vector<1x128xi32> to vector<16x128xi32>
    %69 = arith.cmpi eq, %67, %68 : vector<16x128xi32>
    %70 = arith.extui %69 : vector<16x128xi1> to vector<16x128xi32>
    %71 = arith.sitofp %70 : vector<16x128xi32> to vector<16x128xf32>
    %72 = arith.truncf %71 : vector<16x128xf32> to vector<16x128xbf16>
    %73 = vector.broadcast %45 : vector<128x1xi32> to vector<128x128xi32>
    %74 = vector.broadcast %60 : vector<1x128xi32> to vector<128x128xi32>
    %75 = arith.cmpi eq, %73, %74 : vector<128x128xi32>
    %76 = arith.extui %75 : vector<128x128xi1> to vector<128x128xi32>
    %77 = arith.sitofp %76 : vector<128x128xi32> to vector<128x128xf32>
    %78 = arith.truncf %77 : vector<128x128xf32> to vector<128x128xbf16>
    %79 = vector.broadcast %58 : vector<128x1xi32> to vector<128x128xi32>
    %80 = vector.broadcast %60 : vector<1x128xi32> to vector<128x128xi32>
    %81 = arith.cmpi eq, %79, %80 : vector<128x128xi32>
    %82 = arith.extui %81 : vector<128x128xi1> to vector<128x128xi32>
    %83 = arith.sitofp %82 : vector<128x128xi32> to vector<128x128xf32>
    %84 = arith.truncf %83 : vector<128x128xf32> to vector<128x128xbf16>
    %85 = arith.truncf %4 : vector<8x128xf32> to vector<8x128xbf16>
    %86 = vector.shape_cast %85 : vector<8x128xbf16> to vector<8x1x128xbf16>
    %87 = vector.shape_cast %66 : vector<16x128xbf16> to vector<1x16x128xbf16>
    %88 = vector.broadcast %86 : vector<8x1x128xbf16> to vector<8x16x128xbf16>
    %89 = vector.broadcast %87 : vector<1x16x128xbf16> to vector<8x16x128xbf16>
    %90 = arith.mulf %88, %89 : vector<8x16x128xbf16>
    %91 = vector.shape_cast %90 : vector<8x16x128xbf16> to vector<128x128xbf16>
    %92 = vector.shape_cast %85 : vector<8x128xbf16> to vector<8x1x128xbf16>
    %93 = vector.shape_cast %72 : vector<16x128xbf16> to vector<1x16x128xbf16>
    %94 = vector.broadcast %92 : vector<8x1x128xbf16> to vector<8x16x128xbf16>
    %95 = vector.broadcast %93 : vector<1x16x128xbf16> to vector<8x16x128xbf16>
    %96 = arith.mulf %94, %95 : vector<8x16x128xbf16>
    %97 = vector.shape_cast %96 : vector<8x16x128xbf16> to vector<128x128xbf16>
    %c0_20 = arith.constant 0 : index
    %c0_21 = arith.constant 0 : index
    %c0_22 = arith.constant 0 : index
    %98 = vector.load %arg5[%c0_20, %c0_21, %c0_22] : memref<3x128x128xf32, #tpu.memory_space<vmem>>, vector<1x128x128xf32>
    %99 = vector.shape_cast %98 : vector<1x128x128xf32> to vector<128x128xf32>
    %cst_23 = arith.constant dense<0.000000e+00> : vector<128x128xf32>
    %100 = tpu.matmul %91, %78, %cst_23 {dimension_numbers = #tpu.dot_dimension_numbers<[1], [0], [0], [1], [0, 0, 1, 1], [], []>} : vector<128x128xbf16>, vector<128x128xbf16>, vector<128x128xf32> -> vector<128x128xf32>
    %101 = arith.addf %99, %100 : vector<128x128xf32>
    %c0_24 = arith.constant 0 : index
    %c0_25 = arith.constant 0 : index
    %c0_26 = arith.constant 0 : index
    %102 = vector.load %arg5[%c0_24, %c0_25, %c0_26] : memref<3x128x128xf32, #tpu.memory_space<vmem>>, vector<1x128x128xf32>
    %103 = vector.shape_cast %102 : vector<1x128x128xf32> to vector<128x128xf32>
    %104 = vector.shape_cast %101 : vector<128x128xf32> to vector<1x128x128xf32>
    tpu.vector_store %arg5[%c0_24, %c0_25, %c0_26], %104 {strides = array<i32>} : memref<3x128x128xf32, #tpu.memory_space<vmem>>, vector<1x128x128xf32>,
    %c1 = arith.constant 1 : index
    %c0_27 = arith.constant 0 : index
    %c0_28 = arith.constant 0 : index
    %105 = vector.load %arg5[%c1, %c0_27, %c0_28] : memref<3x128x128xf32, #tpu.memory_space<vmem>>, vector<1x128x128xf32>
    %106 = vector.shape_cast %105 : vector<1x128x128xf32> to vector<128x128xf32>
    %cst_29 = arith.constant dense<0.000000e+00> : vector<128x128xf32>
    %107 = tpu.matmul %91, %84, %cst_29 {dimension_numbers = #tpu.dot_dimension_numbers<[1], [0], [0], [1], [0, 0, 1, 1], [], []>} : vector<128x128xbf16>, vector<128x128xbf16>, vector<128x128xf32> -> vector<128x128xf32>
    %108 = arith.addf %106, %107 : vector<128x128xf32>
    %c1_30 = arith.constant 1 : index
    %c0_31 = arith.constant 0 : index
    %c0_32 = arith.constant 0 : index
    %109 = vector.load %arg5[%c1_30, %c0_31, %c0_32] : memref<3x128x128xf32, #tpu.memory_space<vmem>>, vector<1x128x128xf32>
    %110 = vector.shape_cast %109 : vector<1x128x128xf32> to vector<128x128xf32>
    %111 = vector.shape_cast %108 : vector<128x128xf32> to vector<1x128x128xf32>
    tpu.vector_store %arg5[%c1_30, %c0_31, %c0_32], %111 {strides = array<i32>} : memref<3x128x128xf32, #tpu.memory_space<vmem>>, vector<1x128x128xf32>,
    %c2 = arith.constant 2 : index
    %c0_33 = arith.constant 0 : index
    %c0_34 = arith.constant 0 : index
    %112 = vector.load %arg5[%c2, %c0_33, %c0_34] : memref<3x128x128xf32, #tpu.memory_space<vmem>>, vector<1x128x128xf32>
    %113 = vector.shape_cast %112 : vector<1x128x128xf32> to vector<128x128xf32>
    %cst_35 = arith.constant dense<0.000000e+00> : vector<128x128xf32>
    %114 = tpu.matmul %97, %84, %cst_35 {dimension_numbers = #tpu.dot_dimension_numbers<[1], [0], [0], [1], [0, 0, 1, 1], [], []>} : vector<128x128xbf16>, vector<128x128xbf16>, vector<128x128xf32> -> vector<128x128xf32>
    %115 = arith.addf %113, %114 : vector<128x128xf32>
    %c2_36 = arith.constant 2 : index
    %c0_37 = arith.constant 0 : index
    %c0_38 = arith.constant 0 : index
    %116 = vector.load %arg5[%c2_36, %c0_37, %c0_38] : memref<3x128x128xf32, #tpu.memory_space<vmem>>, vector<1x128x128xf32>
    %117 = vector.shape_cast %116 : vector<1x128x128xf32> to vector<128x128xf32>
    %118 = vector.shape_cast %115 : vector<128x128xf32> to vector<1x128x128xf32>
    tpu.vector_store %arg5[%c2_36, %c0_37, %c0_38], %118 {strides = array<i32>} : memref<3x128x128xf32, #tpu.memory_space<vmem>>, vector<1x128x128xf32>,
    %c0_i32_39 = arith.constant 0 : i32
    %119 = arith.cmpi eq, %arg1, %c0_i32_39 : i32
    %120 = arith.extui %119 : i1 to i32
    %c0_i32_40 = arith.constant 0 : i32
    %121 = arith.cmpi ne, %120, %c0_i32_40 : i32
    scf.if %121 {
      %c0_41 = arith.constant 0 : index
      %c0_42 = arith.constant 0 : index
      %c0_43 = arith.constant 0 : index
      %122 = vector.load %arg5[%c0_41, %c0_42, %c0_43] : memref<3x128x128xf32, #tpu.memory_space<vmem>>, vector<3x128x128xf32>
      %123 = vector.shape_cast %122 : vector<3x128x128xf32> to vector<3x8x16x128xf32>
      %124 = vector.extract_strided_slice %123 {offsets = [0, 6, 0, 0], sizes = [3, 1, 16, 128], strides = [1, 1, 1, 1]} : vector<3x8x16x128xf32> to vector<3x1x16x128xf32>
      %cst_44 = arith.constant 1.000000e+00 : f32
      %125 = vector.broadcast %cst_44 : f32 to vector<3x1x16x128xf32>
      %126 = arith.maximumf %124, %125 : vector<3x1x16x128xf32>
      %127 = tpu.reciprocal %126 {approx = true} : vector<3x1x16x128xf32> -> vector<3x1x16x128xf32>
      %128 = vector.broadcast %127 : vector<3x1x16x128xf32> to vector<3x8x16x128xf32>
      %129 = arith.mulf %123, %128 : vector<3x8x16x128xf32>
      %130 = vector.shape_cast %129 : vector<3x8x16x128xf32> to vector<24x16x128xf32>
      %131 = arith.truncf %130 : vector<24x16x128xf32> to vector<24x16x128xbf16>
      %c0_45 = arith.constant 0 : index
      %c0_46 = arith.constant 0 : index
      %c0_47 = arith.constant 0 : index
      %c0_48 = arith.constant 0 : index
      %132 = vector.load %arg4[%c0_45, %c0_46, %c0_47, %c0_48] : memref<1x24x16x128xbf16, #tpu.memory_space<vmem>>, vector<1x24x16x128xbf16>
      %133 = vector.shape_cast %132 : vector<1x24x16x128xbf16> to vector<24x16x128xbf16>
      %134 = vector.shape_cast %131 : vector<24x16x128xbf16> to vector<1x24x16x128xbf16>
      tpu.vector_store %arg4[%c0_45, %c0_46, %c0_47, %c0_48], %134 {strides = array<i32>} : memref<1x24x16x128xbf16, #tpu.memory_space<vmem>>, vector<1x24x16x128xbf16>,
    } else {
    }
    return
  }
  func.func @transform_0(%arg0: i32, %arg1: i32) -> (i32, i32, i32) {
    %c0_i32 = arith.constant 0 : i32
    %c0_i32_0 = arith.constant 0 : i32
    return %arg0, %c0_i32, %arg1 : i32, i32, i32
  }
  func.func @transform_1(%arg0: i32, %arg1: i32) -> (i32, i32, i32) {
    %c0_i32 = arith.constant 0 : i32
    %c0_i32_0 = arith.constant 0 : i32
    return %arg0, %arg1, %c0_i32 : i32, i32, i32
  }
  func.func @transform_2(%arg0: i32, %arg1: i32) -> (i32, i32, i32, i32) {
    %c0_i32 = arith.constant 0 : i32
    %c0_i32_0 = arith.constant 0 : i32
    %c0_i32_1 = arith.constant 0 : i32
    %c0_i32_2 = arith.constant 0 : i32
    return %arg0, %c0_i32, %c0_i32_0, %c0_i32_1 : i32, i32, i32, i32
  }
}

</mosaic_0001>

<bundles_post_ra>
// kernel: tpu_custom_call.1
= control target key start
LH: loop header
LB: loop body
LE: loop exit
PB: predicated region body
PF: predicated region fallthrough
CT: control target
= control target key end

     0   :  { %7 = vsyncpa [#allocation4], 0  ;;  %s2429_s0 = inlined_call_operand.vmem [shape: f32[2,8,128], index: 0, kind: input, shape index: {}]   ;;  %s2430_s1 = inlined_call_operand.vmem [shape: f32[2,128,3], index: 1, kind: input, shape index: {}]   ;;  %s2431_s2 = inlined_call_operand.hbm [shape: bf16[2,24,16,128], index: 2, kind: output, shape index: {}]  }
   0x1   :  { %9 = vsyncpa [#allocation4 + $0x1], 0  ;;  %s1948_s9 = smov 0   ;;  %s1950_s10 = smov 0  }
   0x2   :  { %s1952_s11 = smov 0   ;;  %s1954_s12 = smov 0  }
   0x3   :  { %s1956_s13 = smov 0   ;;  %s1958_s14 = smov 0  }
   0x4 LB: > { %s1455_s15 = sadd.s32 4294967295, %s1925_s14   ;;  %s1456_s16 = sadd.s32 4294967294, %s1925_s14   ;;  %s1925_s14 = sphi %s1958_s14, %s15_s14   ;;  %s1921_s13 = sphi %s1956_s13, %s2454_s13   ;;  %s1917_s12 = sphi %s1954_s12, %s2453_s12   ;;  %s1913_s11 = sphi %s1952_s11, %s2452_s11   ;;  %s1909_s10 = sphi %s1950_s10, %s2451_s10   ;;  %s1905_s9 = sphi %s1948_s9, %s2450_s9  }
   0x5   : > { %s27_s17 = sadd.s32 1, %s1921_s13  ;;  %s90_s18 = sadd.s32 1, %s1913_s11 }
   0x6   : > { %p29_p0 = scmp.ge.s32.totalorder %s27_s17, 2  ;;  %p100_p1 = scmp.ne.s32.totalorder %s1913_s11, %s1909_s10 }
   0x7   : > { %p101_p2 = scmp.eq.s32.totalorder %s1455_s15, 1  ;;  %p106_p3 = scmp.ne.s32.totalorder %s1909_s10, %s1905_s9 }
   0x8   : > { %s2456_s17 = smov (%p29_p0, %s27_s17), 0  ;;  %p107_p5 = scmp.eq.s32.totalorder %s1456_s16, 1 }
   0x9   : > { %p1988_p4 = por %p101_p2, %p100_p1  ;;  %s87_s20 = ssub.s32 %s1921_s13, %s2456_s17 }
   0xa   : > { %p1459_p6 = scmp.ge.s32.totalorder %s1925_s14, 1  ;;  %p88_p7 = scmp.eq.s32.totalorder %s87_s20, 0 }
   0xb   : > { %p1995_p8 = por %p107_p5, %p106_p3  ;;  %p148_p9 = scmp.lt.s32.totalorder %s1925_s14, 3 }
   0xc   : > { %s2001_s22 = scalar_select %p88_p7, %s1913_s11, %s90_s18  }
   0xd   : > { %p149_p10 = pnand %p1459_p6, %p148_p9 }
   0xe   : > { %p181_p11 = scmp.lt.s32.totalorder (!%p149_p10), %s1917_s12, 1  ;;  %s178_s4 = sand.u32 (!%p149_p10), 1, %s1909_s10  }
   0xf   : > { %152 = sbr.rel (%p149_p10) target bundleno = 480 (0x1e0), region = 28 }
  0x10   : > { %s1722_s5 = smul.u32 (!%p149_p10), 192, %s178_s4 }
  0x11   : > { %s1757_s7 = smul.u32 (!%p149_p10), 192, %s1917_s12 }
  0x12   : > { %s2323_s6 = scalar_lea.vmem (!%p149_p10), [#allocation3], %s1722_s5 }
  0x13   : > { %s1360_s16 = scalar_lea.hbm (!%p149_p10), %s2431_s2, %s1757_s7  ;;  %s1361_s18 = sshll.u32 (!%p149_p10), %s2323_s6, 4  ;;  %s1362_s18 = int_to_ptr.vmem [resolvable:$true] %s1361_s18 }
  0x14   : > { %v1927_v0 = vmov 2   ;;  %v1928_v1 = vmov 1   ;;  %s2007_s23 = scalar_select %p181_p11, %s1917_s12, 1 }
  0x15   : > { %1820 = vset.pattern.permute.xlu1 %v1927_v0  ;;  %1819 = vset.pattern.permute.xlu0 %v1928_v1  ;;  %s1363_s20 = sshll.u32 %s1360_s16, 4  ;;  %s1349_s12 = scalar_lea.sflag [#allocation4], %s178_s4  ;;  %s1364_s20 = int_to_ptr.hbm [resolvable:$true] %s1363_s20 }
  0x16   : > { %1821 = vset.pattern.permute.xlu2 %v1928_v1  ;;  %s1554_s24 = sshll.u32 %s2007_s23, 7  ;;  %s1460_s28 = sshll.u32 %s2007_s23, 3 }
  0x17   : > { %s2014_s27 = scalar_lea.vmem %s2430_s1, %s1554_s24  ;;  %s187_s3 = scalar_lea.vmem %s2429_s0, %s1460_s28 }
  0x18   : > { %v265_v2 = vld [vmem:[%s2014_s27 + $0x70] sm:$0xff]  ;;  %v263_v3 = vld [vmem:[%s2014_s27 + $0x60] sm:$0xff]  ;;  %v266_v4 = vld [vmem:[%s2014_s27 + $0x78] sm:$0xff]  ;;  %s1861_s23 = sshra.s32 %s1364_s20, 4  ;;  %s1862_s23 = int_to_ptr.hbm [resolvable:$true] %s1861_s23 }
  0x19   : > { %v287_v5 = vadd.f32 1.0, %v265_v2  ;;  %v285_v6 = vadd.f32 1.0, %v263_v3  ;;  %v288_v7 = vadd.f32 1.0, %v266_v4  ;;  %v264_v8 = vld [vmem:[%s2014_s27 + $0x68] sm:$0xff]  ;;  %v258_v10 = vld [vmem:[%s2014_s27 + $0x38] sm:$0xff]  ;;  %v261_v14 = vld [vmem:[%s2014_s27 + $0x50] sm:$0xff]  ;;  %p1868_p1 = scmp.lt.s32.totalorder %s1862_s23, %s2431_s2 }
  0x1a   : > { %v286_v9 = vadd.f32 1.0, %v264_v8  ;;  %v280_v19 = vadd.f32 1.0, %v258_v10  ;;  %v283_v21 = vadd.f32 1.0, %v261_v14  ;;  %v262_v32 = vld [vmem:[%s2014_s27 + $0x58] sm:$0xff]  ;;  %v259_v43 = vld [vmem:[%s2014_s27 + $0x40] sm:$0xff]  ;;  %v260_v48 = vld [vmem:[%s2014_s27 + $0x48] sm:$0xff] }
  0x1b   : > { %v303_v11 = vmul.f32 8.0, %v287_v5  ;;  %v301_v12 = vmul.f32 8.0, %v285_v6  ;;  %v304_v13 = vmul.f32 8.0, %v288_v7  ;;  %v284_v37 = vadd.f32 1.0, %v262_v32  ;;  %v257_v57 = vld [vmem:[%s2014_s27 + $0x30] sm:$0xff]  ;;  %v255_v62 = vld [vmem:[%s2014_s27 + $0x20] sm:$0xff] }
  0x1c   : > { %v302_v15 = vmul.f32 8.0, %v286_v9  ;;  %v296_v27 = vmul.f32 8.0, %v280_v19  ;;  %v299_v29 = vmul.f32 8.0, %v283_v21  ;;  %v281_v47 = vadd.f32 1.0, %v259_v43  ;;  %v254_v9 = vld [vmem:[%s2014_s27 + $0x18] sm:$0xff]  ;;  %v256_v14 = vld [vmem:[%s2014_s27 + $0x28] sm:$0xff] }
  0x1d   : > { %v319_v16 = vfloor.f32 %v303_v11  ;;  %v317_v17 = vfloor.f32 %v301_v12  ;;  %v320_v18 = vfloor.f32 %v304_v13  ;;  %v300_v42 = vmul.f32 8.0, %v284_v37  ;;  %v251_v19 = vld [vmem:[%s2014_s27] sm:$0xff]  ;;  %s1863_s24 = scalar_lea.hbm %s1862_s23, 192 }
  0x1e   : > { %v318_v20 = vfloor.f32 %v302_v15  ;;  %v312_v34 = vfloor.f32 %v296_v27  ;;  %v315_v36 = vfloor.f32 %v299_v29  ;;  %v282_v50 = vadd.f32 1.0, %v260_v48  ;;  %p1864_p12 = scmp.ne.s32.totalorder %s1862_s23, %s1863_s24 }
  0x1f   : > { %v335_v22 = vmax.f32 %v319_v16, 0.0  ;;  %v333_v23 = vmax.f32 %v317_v17, 0.0  ;;  %v336_v26 = vmax.f32 %v320_v18, 0.0  ;;  %v316_v46 = vfloor.f32 %v300_v42 }
  0x20   : > { %v334_v28 = vmax.f32 %v318_v20, 0.0  ;;  %v328_v39 = vmax.f32 %v312_v34, 0.0  ;;  %v331_v41 = vmax.f32 %v315_v36, 0.0  ;;  %v297_v53 = vmul.f32 8.0, %v281_v47  ;;  %p1865_p13 = pnand %p1864_p12, %p1988_p4 }
  0x21   : > { %v351_v24 = vmin.f32 %v335_v22, 15.0  ;;  %v349_v25 = vmin.f32 %v333_v23, 15.0  ;;  %v352_v33 = vmin.f32 %v336_v26, 15.0  ;;  %v332_v52 = vmax.f32 %v316_v46, 0.0 }
  0x22   : > { %v350_v35 = vmin.f32 %v334_v28, 15.0  ;;  %v344_v44 = vmin.f32 %v328_v39, 15.0  ;;  %v347_v45 = vmin.f32 %v331_v41, 15.0  ;;  %v298_v54 = vmul.f32 8.0, %v282_v50  ;;  %p1866_p0 = pneg %p1865_p13 }
  0x23   : > { %v1754_v30 = vcvt.f32.s32 %v351_v24  ;;  %v1750_v31 = vcvt.f32.s32 %v349_v25  ;;  %v1756_v38 = vcvt.f32.s32 %v352_v33  ;;  %v348_v55 = vmin.f32 %v332_v52, 15.0  ;;  %v253_v25 = vld [vmem:[%s2014_s27 + $0x10] sm:$0xff] }
  0x24   : > { %v1752_v40 = vcvt.f32.s32 %v350_v35  ;;  %v2025_v49 = vcvt.f32.s32 %v344_v44  ;;  %v1746_v51 = vcvt.f32.s32 %v347_v45  ;;  %v313_v56 = vfloor.f32 %v297_v53  ;;  %v252_v44 = vld [vmem:[%s2014_s27 + $0x8] sm:$0xff]  ;;  %s1867_s27 = scalar_lea.hbm %s2431_s2, 384 }
  0x25   : > { %539 = vperm.xlu1 %1820, %v1754_v30   ;;  %435 = vperm.xlu0 %1819, %v1754_v30   ;;  %v314_v58 = vfloor.f32 %v298_v54  ;;  %v279_v59 = vadd.f32 1.0, %v257_v57  ;;  %v1748_v60 = vcvt.f32.s32 %v348_v55  ;;  %v277_v4 = vadd.f32 1.0, %v255_v62  ;;  %p1869_p2 = scmp.lt.s32.totalorder %s1867_s27, %s1863_s24 }
  0x26   : > { %429 = vperm.xlu2 %1821, %v1750_v31   ;;  %v329_v61 = vmax.f32 %v313_v56, 0.0  ;;  %v276_v13 = vadd.f32 1.0, %v254_v9  ;;  %v278_v18 = vadd.f32 1.0, %v256_v14  ;;  %v273_v23 = vadd.f32 1.0, %v251_v19 }
  0x27   : > { %v330_v63 = vmax.f32 %v314_v58, 0.0  ;;  %v295_v2 = vmul.f32 8.0, %v279_v59  ;;  %v293_v8 = vmul.f32 8.0, %v277_v4  ;;  %v275_v30 = vadd.f32 1.0, %v253_v25  ;;  %p1870_p3 = por %p1869_p2, %p1868_p1 }
  0x28   : > { %v345_v3 = vmin.f32 %v329_v61, 15.0  ;;  %v292_v17 = vmul.f32 8.0, %v276_v13  ;;  %v294_v24 = vmul.f32 8.0, %v278_v18  ;;  %v289_v28 = vmul.f32 8.0, %v273_v23 }
  0x29   : > { %v346_v5 = vmin.f32 %v330_v63, 15.0  ;;  %v311_v6 = vfloor.f32 %v295_v2  ;;  %v309_v12 = vfloor.f32 %v293_v8  ;;  %v291_v34 = vmul.f32 8.0, %v275_v30  ;;  %p1871_p5 = pnand %p1870_p3, %p1866_p0 }
  0x2a   : > { %v1742_v7 = vcvt.f32.s32 %v345_v3  ;;  %v308_v22 = vfloor.f32 %v292_v17  ;;  %v310_v29 = vfloor.f32 %v294_v24  ;;  %v305_v32 = vfloor.f32 %v289_v28 }
  0x2b   : > { %v1744_v10 = vcvt.f32.s32 %v346_v5  ;;  %v327_v11 = vmax.f32 %v311_v6, 0.0  ;;  %v325_v16 = vmax.f32 %v309_v12, 0.0  ;;  %v274_v46 = vadd.f32 1.0, %v252_v44 }
  0x2c   : > { %v324_v27 = vmax.f32 %v308_v22, 0.0  ;;  %v326_v33 = vmax.f32 %v310_v29, 0.0  ;;  %v321_v36 = vmax.f32 %v305_v32, 0.0  ;;  %v369_v57 = vlaneseq }
  0x2d   : > { %542 = vperm.xlu1 %1820, %v1756_v38   ;;  %438 = vperm.xlu0 %1819, %v1756_v38   ;;  %v343_v15 = vmin.f32 %v327_v11, 15.0  ;;  %v341_v21 = vmin.f32 %v325_v16, 15.0  ;;  %v307_v38 = vfloor.f32 %v291_v34  ;;  %v290_v47 = vmul.f32 8.0, %v274_v46 }
  0x2e   : > { %432 = vperm.xlu2 %1821, %v1752_v40   ;;  %v342_v37 = vmin.f32 %v326_v33, 15.0  ;;  %v337_v39 = vmin.f32 %v321_v36, 15.0  ;;  %v2050_v58 = vand.u32 127, %v369_v57  ;;  %v370_v36 = vshrl.u32 %v369_v57, 7 }
  0x2f   : > { %v1738_v20 = vcvt.f32.s32 %v343_v15  ;;  %v1734_v26 = vcvt.f32.s32 %v341_v21  ;;  %v323_v41 = vmax.f32 %v307_v38, 0.0  ;;  %v306_v48 = vfloor.f32 %v290_v47 }
  0x30   : > { %v1726_v42 = vcvt.f32.s32 %v337_v39 }
  0x31   : > { %v339_v43 = vmin.f32 %v323_v41, 15.0 }
  0x33   : > { %v1730_v45 = vcvt.f32.s32 %v339_v43 }
  0x35   : > { %536 = vperm.xlu1 %1820, %v1752_v40   ;;  %414 = vperm.xlu0 %1819, %v2025_v49   ;;  %v1736_v40 = vcvt.f32.s32 %v342_v37 }
  0x36   : > { %423 = vperm.xlu2 %1821, %v1746_v51  }
  0x3d   : > { %1822 = vset.pattern.permute.xlu1 %v1928_v1  ;;  %1826 = vset.pattern.permute.xlu0 %v1927_v0 }
  0x3e   : > { %426 = vperm.xlu1 %1822, %v1748_v60   ;;  %533 = vperm.xlu0 %1826, %v1750_v31   ;;  %v340_v31 = vmin.f32 %v324_v27, 15.0 }
  0x3f   : > { %1823 = vset.pattern.permute.xlu2 %v1927_v0 }
  0x40   : > { %527 = vperm.xlu2 %1823, %v1746_v51   ;;  %v1732_v35 = vcvt.f32.s32 %v340_v31 }
  0x46   : > { %417 = vperm.xlu1 %1822, %v1742_v7   ;;  %530 = vperm.xlu0 %1826, %v1748_v60  }
  0x48   : > { %1824 = vset.pattern.permute.xlu2 %v1928_v1 }
  0x49   : > { %420 = vperm.xlu2 %1824, %v1744_v10  }
  0x4e   : > { %1825 = vset.pattern.permute.xlu1 %v1927_v0  ;;  %521 = vperm.xlu0 %1826, %v1742_v7  }
  0x4f   : > { %524 = vperm.xlu1 %1825, %v1744_v10   ;;  %v250_v10 = vld [vmem:[%s187_s3] sm:$0xff] }
  0x50   : > { %v267_v12 = vadd.f32 1.0, %v250_v10  ;;  %v2110_v13 = vpack.c.bf16 %v250_v10, %v250_v10 }
  0x51   : > { %411 = vperm.xlu2 %1824, %v1738_v20  }
  0x52   : > { %v268_v16 = vmul.f32 8.0, %v267_v12  ;;  %v2117_v17 = vrot.slane %v2110_v13, 3 }
  0x56   : > { %509 = vperm.xlu0 %1826, %v1734_v26  }
  0x57   : > { %515 = vperm.xlu1 %1825, %v1738_v20   ;;  %v269_v20 = vfloor.f32 %v268_v16 }
  0x59   : > { %1827 = vset.pattern.permute.xlu2 %v1927_v0  ;;  %v270_v25 = vmax.f32 %v269_v20, 0.0 }
  0x5a   : > { %518 = vperm.xlu2 %1827, %v2025_v49   ;;  %v322_v49 = vmax.f32 %v306_v48, 0.0 }
  0x5b   : > { %v271_v29 = vmin.f32 %v270_v25, 15.0 }
  0x5c   : > { %v338_v50 = vmin.f32 %v322_v49, 15.0 }
  0x5e   : > { %506 = vperm.xlu0 %1826, %v1732_v35   ;;  %v1728_v51 = vcvt.f32.s32 %v338_v50  ;;  %v1930_v50 = vmov 0.0  }
  0x5f   : > { %1828 = vset.pattern.permute.xlu1 %v1928_v1 }
  0x60   : > { %405 = vperm.xlu1 %1828, %v1734_v26  }
  0x62   : > { %1829 = vset.pattern.permute.xlu2 %v1928_v1 }
  0x63   : > { %408 = vperm.xlu2 %1829, %v1736_v40  }
  0x66   : > { %497 = vperm.xlu0 %1826, %v1726_v42  }
  0x68   : > { %1830 = vset.pattern.permute.xlu1 %v1927_v0 }
  0x69   : > { %512 = vperm.xlu1 %1830, %v1736_v40   ;;  %v371_v40 = vadd.s32 8, %v370_v36 }
  0x6b   : > { %399 = vperm.xlu2 %1829, %v1730_v45  }
  0x71   : > { %1831 = vset.pattern.permute.xlu1 %v1928_v1 }
  0x72   : > { %402 = vperm.xlu1 %1831, %v1732_v35   ;;  %v1724_v35 = vcvt.f32.s32 %v271_v29 }
  0x73   : > { %1832 = vset.pattern.permute.xlu2 %v1927_v0 }
  0x74   : > { %503 = vperm.xlu2 %1832, %v1730_v45   ;;  %v374_v39 = vperm.slane %v1724_v35, 0 }
  0x7a   : > { %393 = vperm.xlu1 %1831, %v1726_v42  }
  0x7c   : > { %1833 = vset.pattern.permute.xlu2 %v1928_v1  ;;  %v1929_v1 = vmov 1.0|1.0  }
  0x7d   : > { %396 = vperm.xlu2 %1833, %v1728_v51  }
  0x80   : > { %v430_v52 = vpop.permute.xlu2 %429 }
  0x81   : > { %vm452_vm6 = vcmp.eq.s32.totalorder %v430_v52, %v2050_v58 }
  0x82   : > { %1834 = vset.pattern.permute.xlu1 %v1927_v0 }
  0x83   : > { %500 = vperm.xlu1 %1834, %v1728_v51  }
  0x88   : > { %v433_v53 = vpop.permute.xlu2 %432 }
  0x89   : > { %vm453_vm7 = vcmp.eq.s32.totalorder %v433_v53, %v2050_v58 }
  0x8a   : > { %vm1505_vm8 = vmpackc.low %vm453_vm7, %vm452_vm6 }
  0x90   : > { %v424_v54 = vpop.permute.xlu2 %423 }
  0x91   : > { %vm450_vm9 = vcmp.eq.s32.totalorder %v424_v54, %v2050_v58 }
  0x97   : > { %v540_v55 = vpop.permute.xlu1 %539  ;;  %v436_v56 = vpop.permute.xlu0 %435 }
  0x98   : > { %vm454_vm0 = vcmp.eq.s32.totalorder %v436_v56, %v2050_v58  ;;  %vm558_vm1 = vcmp.eq.s32.totalorder %v540_v55, %v2050_v58 }
  0x9a   : > { %v528_v59 = vpop.permute.xlu2 %527 }
  0x9f   : > { %v543_v60 = vpop.permute.xlu1 %542  ;;  %v439_v61 = vpop.permute.xlu0 %438 }
  0xa0   : > { %vm559_vm2 = vcmp.eq.s32.totalorder %v543_v60, %v2050_v58  ;;  %vm455_vm3 = vcmp.eq.s32.totalorder %v439_v61, %v2050_v58 }
  0xa1   : > { %vm2056_vm4 = vmpackc.low %vm559_vm2, %vm558_vm1 }
  0xa2   : > { %vm1503_vm5 = vmpackc.low %vm455_vm3, %vm454_vm0  ;;  %1520 = vmatpush.bf16.msk.msra.mxu1 %vm2056_vm4, %v1929_v1  ;;  %1536 = vmatpush.bf16.msk.msra.mxu2 %vm2056_vm4, %v1929_v1  ;;  %vm554_vm0 = vcmp.eq.s32.totalorder %v528_v59, %v2050_v58 }
  0xa3   : > { %1504 = vmatpush.bf16.msk.msra.mxu0 %vm1503_vm5, %v1929_v1  ;;  %1698 = vmatpush.bf16.msk.msra.mxu3 %vm1503_vm5, %v1929_v1  ;;  %v421_v2 = vpop.permute.xlu2 %420 }
  0xa4   : > { %vm449_vm15 = vcmp.eq.s32.totalorder %v421_v2, %v2050_v58 }
  0xa7   : > { %1506 = vmatpush.bf16.msk.msra.mxu0 %vm1505_vm8, %v1929_v1  ;;  %1699 = vmatpush.bf16.msk.msra.mxu3 %vm1505_vm8, %v1929_v1  ;;  %v537_v62 = vpop.permute.xlu1 %536  ;;  %v415_v63 = vpop.permute.xlu0 %414 }
  0xa8   : > { %vm557_vm12 = vcmp.eq.s32.totalorder %v537_v62, %v2050_v58  ;;  %vm447_vm5 = vcmp.eq.s32.totalorder %v415_v63, %v2050_v58  ;;  %v383_v63 = vperm.slane %v1724_v35, 1 }
  0xab   : > { %v412_v5 = vpop.permute.xlu2 %411 }
  0xac   : > { %vm446_vm6 = vcmp.eq.s32.totalorder %v412_v5, %v2050_v58 }
  0xad   : > { %vm1511_vm8 = vmpackc.low %vm447_vm5, %vm446_vm6  ;;  %vm375_vm6 = vcmp.eq.s32.totalorder %v370_v36, %v374_v39 }
  0xae   : > { %v2156_v51 = vsel %vm375_vm6, 1.0, %v1930_v50 }
  0xb0   : > { %v427_v3 = vpop.permute.xlu1 %426  ;;  %v534_v4 = vpop.permute.xlu0 %533 }
  0xb1   : > { %vm451_vm10 = vcmp.eq.s32.totalorder %v427_v3, %v2050_v58  ;;  %vm556_vm11 = vcmp.eq.s32.totalorder %v534_v4, %v2050_v58 }
  0xb2   : > { %vm1507_vm13 = vmpackc.low %vm451_vm10, %vm450_vm9 }
  0xb3   : > { %vm2076_vm14 = vmpackc.low %vm557_vm12, %vm556_vm11  ;;  %1508 = vmatpush.bf16.msk.msra.mxu0 %vm1507_vm13, %v1929_v1  ;;  %1700 = vmatpush.bf16.msk.msra.mxu3 %vm1507_vm13, %v1929_v1  ;;  %vm616_vm12 = vcmask 1043459   ;;  %vm603_vm13 = vcmask 1040384  }
  0xb4   : > { %1522 = vmatpush.bf16.msk.msra.mxu1 %vm2076_vm14, %v1929_v1  ;;  %1538 = vmatpush.bf16.msk.msra.mxu2 %vm2076_vm14, %v1929_v1  ;;  %v519_v11 = vpop.permute.xlu2 %518  ;;  %v617_v21 = vsel %vm616_vm12, %v2110_v13, %v2117_v17  ;;  %v606_v23 = vsel %vm603_vm13, %v2110_v13, %v2117_v17 }
  0xb5   : > { %v619_v24 = vrot.slane %v617_v21, 3  ;;  %v1499_v27 = vpack.i.b16 %v606_v23, %v606_v23  ;;  %v621_v43 = vunpack.i.h.s16 %v606_v23 }
  0xb7   : > { %v1502_v28 = vpack.i.b16 %v619_v24, %v619_v24  ;;  %v636_v31 = vperm.slane %v1499_v27, 0  ;;  %v627_v45 = vunpack.i.h.s16 %v619_v24  ;;  %v629_v53 = vpack.i.b16 %v621_v43, %v621_v43 }
  0xb8   : > { %v418_v7 = vpop.permute.xlu1 %417  ;;  %v531_v8 = vpop.permute.xlu0 %530 }
  0xb9   : > { %vm448_vm1 = vcmp.eq.s32.totalorder %v418_v7, %v2050_v58  ;;  %vm555_vm2 = vcmp.eq.s32.totalorder %v531_v8, %v2050_v58  ;;  %v642_v33 = vperm.slane %v1502_v28, 0  ;;  %v645_v37 = vpack.i.b16 %v636_v31, %v636_v31 }
  0xba   : > { %vm1509_vm3 = vmpackc.low %vm449_vm15, %vm448_vm1  ;;  %vm551_vm15 = vcmp.eq.s32.totalorder %v519_v11, %v2050_v58  ;;  %v635_v55 = vpack.i.b16 %v627_v45, %v627_v45  ;;  %v637_v61 = vperm.slane %v629_v53, 0 }
  0xbb   : > { %vm2098_vm7 = vmpackc.low %vm555_vm2, %vm554_vm0  ;;  %1510 = vmatpush.bf16.msk.msra.mxu0 %vm1509_vm3, %v1929_v1  ;;  %1701 = vmatpush.bf16.msk.msra.mxu3 %vm1509_vm3, %v1929_v1  ;;  %v669_v38 = vpack.i.b16 %v642_v33, %v642_v33  ;;  %v647_v41 = vperm.slane %v645_v37, 0 }
  0xbc   : > { %1524 = vmatpush.bf16.msk.msra.mxu1 %vm2098_vm7, %v1929_v1  ;;  %1540 = vmatpush.bf16.msk.msra.mxu2 %vm2098_vm7, %v1929_v1  ;;  %v643_v2 = vperm.slane %v635_v55, 0  ;;  %v649_v8 = vpack.i.b16 %v637_v61, %v637_v61 }
  0xbd   : > { %v409_v19 = vpop.permute.xlu2 %408  ;;  %v671_v42 = vperm.slane %v669_v38, 0  ;;  %v676_v48 = vunpack.c.l.bf16 %v647_v41 }
  0xbe   : > { %vm445_vm2 = vcmp.eq.s32.totalorder %v409_v19, %v2050_v58  ;;  %v673_v11 = vpack.i.b16 %v643_v2, %v643_v2  ;;  %v651_v21 = vperm.slane %v649_v8, 0 }
  0xbf   : > { %1512 = vmatpush.bf16.msk.msra.mxu0 %vm1511_vm8, %v1929_v1  ;;  %1702 = vmatpush.bf16.msk.msra.mxu3 %vm1511_vm8, %v1929_v1  ;;  %vm376_vm8 = vcmp.eq.s32.totalorder %v371_v40, %v374_v39  ;;  %v2158_v52 = vunpack.c.l.bf16 %v671_v42  ;;  %v686_v56 = vmul.f32 %v2156_v51, %v676_v48 }
  0xc0   : > { %v522_v14 = vpop.permute.xlu0 %521  ;;  %v2168_v54 = vsel %vm376_vm8, 1.0, %v1930_v50  ;;  %vm384_vm8 = vcmp.eq.s32.totalorder %v370_v36, %v383_v63  ;;  %v675_v24 = vperm.slane %v673_v11, 0 }
  0xc1   : > { %vm552_vm9 = vcmp.eq.s32.totalorder %v522_v14, %v2050_v58  ;;  %v525_v15 = vpop.permute.xlu1 %524  ;;  %v687_v59 = vmul.f32 %v2168_v54, %v676_v48  ;;  %v698_v60 = vmul.f32 %v2156_v51, %v2158_v52  ;;  %v699_v62 = vmul.f32 %v2168_v54, %v2158_v52 }
  0xc2   : > { %vm553_vm10 = vcmp.eq.s32.totalorder %v525_v15, %v2050_v58  ;;  %v702_v4 = vpack.c.bf16 %v686_v56, %v686_v56  ;;  %v2192_v19 = vsel %vm384_vm8, 1.0, %v1930_v50  ;;  %v2202_v33 = vunpack.c.l.bf16 %v675_v24 }
  0xc3   : > { %vm2119_vm11 = vmpackc.low %vm553_vm10, %vm552_vm9  ;;  %v703_v5 = vpack.c.bf16 %v687_v59, %v687_v59  ;;  %v714_v7 = vpack.c.bf16 %v698_v60, %v698_v60  ;;  %v715_v10 = vpack.c.bf16 %v699_v62, %v699_v62  ;;  %v720_v28 = vmul.f32 %v2192_v19, %v676_v48 }
  0xc4   : > { %1526 = vmatpush.bf16.msk.msra.mxu1 %vm2119_vm11, %v1929_v1  ;;  %1542 = vmatpush.bf16.msk.msra.mxu2 %vm2119_vm11, %v1929_v1  ;;  %v784_v15 = vunpack.c.l.b16 %v702_v4  ;;  %v701_v41 = vmul.f32 %v2168_v54, %v2202_v33  ;;  %v732_v26 = vmul.f32 %v2192_v19, %v2158_v52  ;;  %v734_v55 = vmul.f32 %v2192_v19, %v2202_v33 }
  0xc5   : > { %v400_v30 = vpop.permute.xlu2 %399  ;;  %v785_v16 = vunpack.c.l.b16 %v703_v5  ;;  %v797_v23 = vunpack.c.l.b16 %v715_v10  ;;  %v736_v35 = vpack.c.bf16 %v720_v28, %v720_v28 }
  0xc7   : > { %v800_v31 = vpack.c.b16 %v785_v16, %v784_v15  ;;  %v1028_v43 = vunpack.c.l.b16 %v736_v35 }
  0xc8   : > { %v510_v32 = vpop.permute.xlu0 %509 }
  0xc9   : > { %v516_v22 = vpop.permute.xlu1 %515  ;;  %vm548_vm9 = vcmp.eq.s32.totalorder %v510_v32, %v2050_v58 }
  0xca   : > { %vm550_vm0 = vcmp.eq.s32.totalorder %v516_v22, %v2050_v58  ;;  %v796_v22 = vunpack.c.l.b16 %v714_v7 }
  0xcb   : > { %vm2135_vm1 = vmpackc.low %vm551_vm15, %vm550_vm0 }
  0xcc   : > { %1528 = vmatpush.bf16.msk.msra.mxu1 %vm2135_vm1, %v1929_v1  ;;  %1544 = vmatpush.bf16.msk.msra.mxu2 %vm2135_vm1, %v1929_v1  ;;  %v2200_v32 = vpack.c.b16 %v797_v23, %v796_v22 }
  0xce   : > { %v504_v44 = vpop.permute.xlu2 %503 }
  0xcf   : > { %vm546_vm15 = vcmp.eq.s32.totalorder %v504_v44, %v2050_v58 }
  0xd0   : > { %v507_v46 = vpop.permute.xlu0 %506 }
  0xd1   : > { %vm547_vm13 = vcmp.eq.s32.totalorder %v507_v46, %v2050_v58 }
  0xd2   : > { %v406_v34 = vpop.permute.xlu1 %405  ;;  %vm2171_vm0 = vmpackc.low %vm547_vm13, %vm546_vm15 }
  0xd3   : > { %vm444_vm3 = vcmp.eq.s32.totalorder %v406_v34, %v2050_v58 }
  0xd4   : > { %vm1513_vm5 = vmpackc.low %vm445_vm2, %vm444_vm3  ;;  %vm442_vm2 = vcmp.eq.s32.totalorder %v400_v30, %v2050_v58  ;;  %vm608_vm3 = vcmask 1041409   ;;  %v677_v30 = vunpack.c.l.bf16 %v651_v21 }
  0xd5   : > { %1514 = vmatpush.bf16.msk.msra.mxu0 %vm1513_vm5, %v1929_v1  ;;  %1703 = vmatpush.bf16.msk.msra.mxu3 %vm1513_vm5, %v1929_v1  ;;  %v609_v12 = vsel %vm608_vm3, %v2110_v13, %v2117_v17 }
  0xd6   : > { %v611_v25 = vrot.slane %v609_v12, 1  ;;  %v688_v37 = vmul.f32 %v2156_v51, %v677_v30  ;;  %v689_v38 = vmul.f32 %v2168_v54, %v677_v30  ;;  %v722_v2 = vmul.f32 %v2192_v19, %v677_v30 }
  0xd7   : > { %v397_v14 = vpop.permute.xlu2 %396 }
  0xd8   : > { %v1500_v34 = vpack.i.b16 %v611_v25, %v611_v25  ;;  %v498_v39 = vpop.permute.xlu0 %497  ;;  %v704_v46 = vpack.c.bf16 %v688_v37, %v688_v37  ;;  %v738_v10 = vpack.c.bf16 %v722_v2, %v722_v2 }
  0xda   : > { %v638_v42 = vperm.slane %v1500_v34, 0  ;;  %v1030_v16 = vunpack.c.l.b16 %v738_v10 }
  0xdb   : > { %v513_v47 = vpop.permute.xlu1 %512 }
  0xdc   : > { %vm549_vm10 = vcmp.eq.s32.totalorder %v513_v47, %v2050_v58  ;;  %v705_v47 = vpack.c.bf16 %v689_v38, %v689_v38  ;;  %v653_v53 = vpack.i.b16 %v638_v42, %v638_v42 }
  0xdd   : > { %vm2152_vm12 = vmpackc.low %vm549_vm10, %vm548_vm9  ;;  %vm385_vm9 = vcmp.eq.s32.totalorder %v371_v40, %v383_v63  ;;  %vm441_vm10 = vcmp.eq.s32.totalorder %v397_v14, %v2050_v58  ;;  %v700_v40 = vmul.f32 %v2156_v51, %v2202_v33  ;;  %v623_v63 = vunpack.i.h.s16 %v611_v25 }
  0xde   : > { %1530 = vmatpush.bf16.msk.msra.mxu1 %vm2152_vm12, %v1929_v1  ;;  %1546 = vmatpush.bf16.msk.msra.mxu2 %vm2152_vm12, %v1929_v1  ;;  %v2194_v20 = vsel %vm385_vm9, 1.0, %v1930_v50  ;;  %v717_v50 = vpack.c.bf16 %v701_v41, %v701_v41  ;;  %v787_v59 = vunpack.c.l.b16 %v705_v47  ;;  %v655_v62 = vperm.slane %v653_v53, 0 }
  0xdf   : > { %v721_v29 = vmul.f32 %v2194_v20, %v676_v48  ;;  %v716_v48 = vpack.c.bf16 %v700_v40, %v700_v40  ;;  %v631_v8 = vpack.i.b16 %v623_v63, %v623_v63 }
  0xe0   : > { %v799_v61 = vunpack.c.l.b16 %v717_v50  ;;  %v678_v7 = vunpack.c.l.bf16 %v655_v62  ;;  %v733_v62 = vmul.f32 %v2194_v20, %v2158_v52 }
  0xe1   : > { %v737_v36 = vpack.c.bf16 %v721_v29, %v721_v29  ;;  %v798_v60 = vunpack.c.l.b16 %v716_v48  ;;  %v639_v15 = vperm.slane %v631_v8, 0 }
  0xe2   : > { %1532 = vmatpush.bf16.msk.msra.mxu1 %vm2171_vm0, %v1929_v1  ;;  %1548 = vmatpush.bf16.msk.msra.mxu2 %vm2171_vm0, %v1929_v1  ;;  %v690_v12 = vmul.f32 %v2156_v51, %v678_v7  ;;  %v691_v14 = vmul.f32 %v2168_v54, %v678_v7  ;;  %v724_v34 = vmul.f32 %v2192_v19, %v678_v7 }
  0xe3   : > { %v1029_v44 = vunpack.c.l.b16 %v737_v36  ;;  %v2239_v5 = vpack.c.b16 %v799_v61, %v798_v60  ;;  %v657_v24 = vpack.i.b16 %v639_v15, %v639_v15  ;;  %v725_v35 = vmul.f32 %v2194_v20, %v678_v7 }
  0xe4   : > { %v403_v3 = vpop.permute.xlu1 %402  ;;  %v706_v22 = vpack.c.bf16 %v690_v12, %v690_v12  ;;  %v707_v23 = vpack.c.bf16 %v691_v14, %v691_v14  ;;  %v740_v37 = vpack.c.bf16 %v724_v34, %v724_v34  ;;  %v748_v7 = vpack.c.bf16 %v732_v26, %v732_v26 }
  0xe5   : > { %vm443_vm5 = vcmp.eq.s32.totalorder %v403_v3, %v2050_v58  ;;  %v1044_v56 = vpack.c.b16 %v1029_v44, %v1028_v43  ;;  %v723_v3 = vmul.f32 %v2194_v20, %v677_v30  ;;  %v741_v38 = vpack.c.bf16 %v725_v35, %v725_v35 }
  0xe6   : > { %vm1515_vm6 = vmpackc.low %vm443_vm5, %vm442_vm2  ;;  %vm544_vm2 = vcmp.eq.s32.totalorder %v498_v39, %v2050_v58  ;;  %v788_v29 = vunpack.c.l.b16 %v706_v22  ;;  %v789_v30 = vunpack.c.l.b16 %v707_v23  ;;  %v1032_v42 = vunpack.c.l.b16 %v740_v37 }
  0xe7   : > { %1516 = vmatpush.bf16.msk.msra.mxu0 %vm1515_vm6, %v1929_v1  ;;  %1704 = vmatpush.bf16.msk.msra.mxu3 %vm1515_vm6, %v1929_v1  ;;  %v739_v11 = vpack.c.bf16 %v723_v3, %v723_v3  ;;  %vm612_vm6 = vcmask 1042434   ;;  %v1033_v0 = vunpack.c.l.b16 %v741_v38  ;;  %v749_v8 = vpack.c.bf16 %v733_v62, %v733_v62 }
  0xe8   : > { %v613_v25 = vsel %vm612_vm6, %v2110_v13, %v2117_v17  ;;  %v802_v17 = vpack.c.b16 %v789_v30, %v788_v29  ;;  %v1040_v52 = vunpack.c.l.b16 %v748_v7  ;;  %v750_v35 = vpack.c.bf16 %v734_v55, %v734_v55 }
  0xe9   : > { %v1031_v21 = vunpack.c.l.b16 %v739_v11  ;;  %v615_v28 = vrot.slane %v613_v25, 2  ;;  %v1041_v14 = vunpack.c.l.b16 %v749_v8 }
  0xea   : > { %v1042_v38 = vunpack.c.l.b16 %v750_v35 }
  0xeb   : > { %v1501_v13 = vpack.i.b16 %v615_v28, %v615_v28  ;;  %v625_v48 = vunpack.i.h.s16 %v615_v28  ;;  %v1050_v22 = vpack.c.b16 %v1041_v14, %v1040_v52  ;;  %v735_v28 = vmul.f32 %v2194_v20, %v2202_v33 }
  0xec   : > { %v394_v27 = vpop.permute.xlu1 %393 }
  0xed   : > { %vm440_vm13 = vcmp.eq.s32.totalorder %v394_v27, %v2050_v58  ;;  %v1045_v27 = vpack.c.b16 %v1031_v21, %v1030_v16  ;;  %v640_v39 = vperm.slane %v1501_v13, 0  ;;  %v751_v13 = vpack.c.bf16 %v735_v28, %v735_v28 }
  0xee   : > { %vm1517_vm15 = vmpackc.low %vm441_vm10, %vm440_vm13 }
  0xef   : > { %1518 = vmatpush.bf16.msk.msra.mxu0 %vm1517_vm15, %v1929_v1  ;;  %1705 = vmatpush.bf16.msk.msra.mxu3 %vm1517_vm15, %v1929_v1  ;;  %v661_v43 = vpack.i.b16 %v640_v39, %v640_v39  ;;  %v1043_v39 = vunpack.c.l.b16 %v751_v13 }
  0xf1   : > { %v663_v6 = vperm.slane %v661_v43, 0 }
  0xf2   : > { %824 = vmatmul.bf16.vlgmr.msra.gmra.mxu0 %v800_v31  ;;  %854 = vmatmul.bf16.vlgmr.msra.gmra.mxu3 %v2200_v32 }
  0xf3   : > { %1706 = vmatpush.bf16.msk.msrb.mxu3 %vm2056_vm4, %v1929_v1  ;;  %v680_v9 = vunpack.c.l.bf16 %v663_v6 }
  0xf5   : > { %v501_v45 = vpop.permute.xlu1 %500  ;;  %v694_v60 = vmul.f32 %v2156_v51, %v680_v9  ;;  %v695_v61 = vmul.f32 %v2168_v54, %v680_v9  ;;  %v728_v57 = vmul.f32 %v2192_v19, %v680_v9  ;;  %v729_v16 = vmul.f32 %v2194_v20, %v680_v9 }
  0xf6   : > { %vm545_vm3 = vcmp.eq.s32.totalorder %v501_v45, %v2050_v58  ;;  %v786_v58 = vunpack.c.l.b16 %v704_v46  ;;  %v1046_v46 = vpack.c.b16 %v1033_v0, %v1032_v42 }
  0xf7   : > { %1707 = vmatpush.bf16.msk.msrb.mxu3 %vm2076_vm14, %v1929_v1  ;;  %vm2221_vm5 = vmpackc.low %vm545_vm3, %vm544_vm2  ;;  %v710_v49 = vpack.c.bf16 %v694_v60, %v694_v60  ;;  %v745_v25 = vpack.c.bf16 %v729_v16, %v729_v16 }
  0xf8   : > { %1534 = vmatpush.bf16.msk.msra.mxu1 %vm2221_vm5, %v1929_v1  ;;  %1550 = vmatpush.bf16.msk.msra.mxu2 %vm2221_vm5, %v1929_v1  ;;  %v801_v4 = vpack.c.b16 %v787_v59, %v786_v58  ;;  %v633_v58 = vpack.i.b16 %v625_v48, %v625_v48 }
  0xf9   : > { %v792_v11 = vunpack.c.l.b16 %v710_v49  ;;  %v1037_v30 = vunpack.c.l.b16 %v745_v25 }
  0xfa   : > { %v641_v63 = vperm.slane %v633_v58, 0 }
  0xfb   : > { %1708 = vmatpush.bf16.msk.msrb.mxu3 %vm2098_vm7, %v1929_v1  ;;  %922 = vmatmul.bf16.vlgmr.msra.gmra.mxu1 %v800_v31  ;;  %v659_v31 = vperm.slane %v657_v24, 0  ;;  %v744_v24 = vpack.c.bf16 %v728_v57, %v728_v57 }
  0xfc   : > { %1068 = vmatmul.bf16.vlgmr.msra.gmra.mxu2 %v1044_v56 }
  0xfd   : > { %v679_v36 = vunpack.c.l.bf16 %v659_v31  ;;  %v1036_v29 = vunpack.c.l.b16 %v744_v24 }
  0xff   : > { %1709 = vmatpush.bf16.msk.msrb.mxu3 %vm2119_vm11, %v1929_v1  ;;  %v692_v40 = vmul.f32 %v2156_v51, %v679_v36  ;;  %v693_v41 = vmul.f32 %v2168_v54, %v679_v36  ;;  %v726_v50 = vmul.f32 %v2192_v19, %v679_v36  ;;  %v727_v53 = vmul.f32 %v2194_v20, %v679_v36 }
 0x101   : > { %v708_v44 = vpack.c.bf16 %v692_v40, %v692_v40  ;;  %v709_v45 = vpack.c.bf16 %v693_v41, %v693_v41  ;;  %v742_v59 = vpack.c.bf16 %v726_v50, %v726_v50  ;;  %v743_v18 = vpack.c.bf16 %v727_v53, %v727_v53 }
 0x102   : > { %829 = vmatmul.bf16.gmra.mxu0 %v801_v4  ;;  %859 = vmatmul.bf16.gmra.mxu3 %v2239_v5  ;;  %v1051_v41 = vpack.c.b16 %v1043_v39, %v1042_v38 }
 0x103   : > { %1710 = vmatpush.bf16.msk.msrb.mxu3 %vm2135_vm1, %v1929_v1  ;;  %v791_v47 = vunpack.c.l.b16 %v709_v45  ;;  %v1034_v2 = vunpack.c.l.b16 %v742_v59  ;;  %v1035_v3 = vunpack.c.l.b16 %v743_v18 }
 0x105   : > { %v1047_v10 = vpack.c.b16 %v1035_v3, %v1034_v2 }
 0x107   : > { %1711 = vmatpush.bf16.msk.msrb.mxu3 %vm2152_vm12, %v1929_v1 }
 0x10b   : > { %1712 = vmatpush.bf16.msk.msrb.mxu3 %vm2171_vm0, %v1929_v1  ;;  %927 = vmatmul.bf16.gmra.mxu1 %v801_v4  ;;  %v711_v4 = vpack.c.bf16 %v695_v61, %v695_v61 }
 0x10c   : > { %1073 = vmatmul.bf16.gmra.mxu2 %v1045_v27 }
 0x10d   : > { %v793_v12 = vunpack.c.l.b16 %v711_v4 }
 0x10f   : > { %1713 = vmatpush.bf16.msk.msrb.mxu3 %vm2221_vm5, %v1929_v1  ;;  %v804_v21 = vpack.c.b16 %v793_v12, %v792_v11 }
 0x112   : > { %834 = vmatmul.bf16.gmra.mxu0 %v802_v17  ;;  %952 = vmatmul.bf16.vlgmr.msrb.gmra.mxu3 %v2200_v32  ;;  %v790_v32 = vunpack.c.l.b16 %v708_v44 }
 0x113   : > { %1714 = vmatpush.bf16.msk.msra.mxu3 %vm2056_vm4, %v1929_v1 }
 0x114   : > { %v803_v56 = vpack.c.b16 %v791_v47, %v790_v32 }
 0x117   : > { %1715 = vmatpush.bf16.msk.msra.mxu3 %vm2076_vm14, %v1929_v1 }
 0x11b   : > { %1716 = vmatpush.bf16.msk.msra.mxu3 %vm2098_vm7, %v1929_v1  ;;  %932 = vmatmul.bf16.gmra.mxu1 %v802_v17  ;;  %v1048_v17 = vpack.c.b16 %v1037_v30, %v1036_v29 }
 0x11c   : > { %1078 = vmatmul.bf16.gmra.mxu2 %v1046_v46 }
 0x11f   : > { %1717 = vmatpush.bf16.msk.msra.mxu3 %vm2119_vm11, %v1929_v1 }
 0x122   : > { %839 = vmatmul.bf16.gmra.mxu0 %v803_v56  ;;  %957 = vmatmul.bf16.gmra.mxu3 %v2239_v5  ;;  %v665_v5 = vpack.i.b16 %v641_v63, %v641_v63 }
 0x123   : > { %1718 = vmatpush.bf16.msk.msra.mxu3 %vm2135_vm1, %v1929_v1 }
 0x124   : > { %v667_v15 = vperm.slane %v665_v5, 0 }
 0x126   : > { %v681_v23 = vunpack.c.l.bf16 %v667_v15 }
 0x127   : > { %1719 = vmatpush.bf16.msk.msra.mxu3 %vm2152_vm12, %v1929_v1 }
 0x128   : > { %v697_v27 = vmul.f32 %v2168_v54, %v681_v23  ;;  %v731_v54 = vmul.f32 %v2194_v20, %v681_v23 }
 0x12a   : > { %v713_v34 = vpack.c.bf16 %v697_v27, %v697_v27  ;;  %v747_v42 = vpack.c.bf16 %v731_v54, %v731_v54 }
 0x12b   : > { %1720 = vmatpush.bf16.msk.msra.mxu3 %vm2171_vm0, %v1929_v1  ;;  %937 = vmatmul.bf16.gmra.mxu1 %v803_v56 }
 0x12c   : > { %1083 = vmatmul.bf16.gmra.mxu2 %v1047_v10  ;;  %v795_v37 = vunpack.c.l.b16 %v713_v34  ;;  %v1039_v43 = vunpack.c.l.b16 %v747_v42 }
 0x12f   : > { %1721 = vmatpush.bf16.msk.msra.mxu3 %vm2221_vm5, %v1929_v1  ;;  %v696_v1 = vmul.f32 %v2156_v51, %v681_v23  ;;  %v730_v51 = vmul.f32 %v2192_v19, %v681_v23 }
 0x131   : > { %v712_v31 = vpack.c.bf16 %v696_v1, %v696_v1  ;;  %v746_v33 = vpack.c.bf16 %v730_v51, %v730_v51 }
 0x132   : > { %844 = vmatmul.bf16.gmra.mxu0 %v804_v21  ;;  %1098 = vmatmul.bf16.vlgmr.msra.gmra.mxu3 %v1050_v22 }
 0x133   : > { %v794_v36 = vunpack.c.l.b16 %v712_v31  ;;  %v1038_v0 = vunpack.c.l.b16 %v746_v33 }
 0x135   : > { %v805_v40 = vpack.c.b16 %v795_v37, %v794_v36  ;;  %v1049_v44 = vpack.c.b16 %v1039_v43, %v1038_v0 }
 0x13b   : > { %942 = vmatmul.bf16.gmra.mxu1 %v804_v21 }
 0x13c   : > { %1088 = vmatmul.bf16.gmra.mxu2 %v1048_v17 }
 0x142   : > { %849 = vmatmul.bf16.gmra.mxu0 %v805_v40  ;;  %1103 = vmatmul.bf16.gmra.mxu3 %v1051_v41 }
 0x14b   : > { %947 = vmatmul.bf16.gmra.mxu1 %v805_v40 }
 0x14c   : > { %1093 = vmatmul.bf16.gmra.mxu2 %v1049_v44 }
 0x16f   : > { %v825_v45 = vpop.f32.mrf.mxu0 }
 0x175   : > { %v855_v46 = vpop.f32.mrf.mxu3 }
 0x176   : > { %v1192_v19 = vmax.f32 %v855_v46, 1.0 }
 0x177   : > { %v827_v6 = vpop.f32.mrf.mxu0 }
 0x178   : > { %v923_v32 = vpop.f32.mrf.mxu1  ;;  %1835 = vrcp.f32 %v1192_v19 }
 0x17d   : > { %v857_v47 = vpop.f32.mrf.mxu3 }
 0x17e   : > { %v1193_v20 = vmax.f32 %v857_v47, 1.0  ;;  %v2309_v9 = vpop.eup %1835 }
 0x17f   : > { %v2306_v48 = vpop.f32.mrf.mxu2  ;;  %v830_v50 = vpop.f32.mrf.mxu0  ;;  %v1204_v18 = vmul.f32 %v2309_v9, %v825_v45  ;;  %v1216_v60 = vmul.f32 %v2309_v9, %v855_v46 }
 0x180   : > { %1837 = vrcp.f32 %v1193_v20  ;;  %v925_v53 = vpop.f32.mrf.mxu1  ;;  %v1206_v59 = vmul.f32 %v2309_v9, %v830_v50 }
 0x185   : > { %v860_v56 = vpop.f32.mrf.mxu3 }
 0x186   : > { %v2313_v58 = vpop.eup %1837  ;;  %v1218_v5 = vmul.f32 %v2309_v9, %v860_v56 }
 0x187   : > { %v1205_v61 = vmul.f32 %v2313_v58, %v827_v6  ;;  %v1217_v26 = vmul.f32 %v2313_v58, %v857_v47  ;;  %v2320_v62 = vpop.f32.mrf.mxu2  ;;  %v832_v63 = vpop.f32.mrf.mxu0 }
 0x188   : > { %v1207_v2 = vmul.f32 %v2313_v58, %v832_v63  ;;  %v928_v3 = vpop.f32.mrf.mxu1 }
 0x189   : > { %v1558_v49 = vpack.c.bf16 %v1205_v61, %v1204_v18  ;;  %v1588_v4 = vpack.c.bf16 %v1217_v26, %v1216_v60 }
 0x18a   : > { %v1563_v7 = vpack.c.bf16 %v1207_v2, %v1206_v59 }
 0x18b   : > { %1559 = vst [vmem:[%s2323_s6] sm:$0xff] %v1558_v49  }
 0x18c   : > { %1680 = vst [vmem:[%s2323_s6 + $0x30] sm:$0xff] %v1588_v4  }
 0x18d   : > { %1675 = vst [vmem:[%s2323_s6 + $0x8] sm:$0xff] %v1563_v7   ;;  %v862_v8 = vpop.f32.mrf.mxu3 }
 0x18e   : > { %v1219_v10 = vmul.f32 %v2313_v58, %v862_v8 }
 0x18f   : > { %v2330_v11 = vpop.f32.mrf.mxu2  ;;  %v835_v12 = vpop.f32.mrf.mxu0 }
 0x190   : > { %v1593_v52 = vpack.c.bf16 %v1219_v10, %v1218_v5  ;;  %v930_v14 = vpop.f32.mrf.mxu1  ;;  %v1208_v21 = vmul.f32 %v2309_v9, %v835_v12 }
 0x192   : > { %1681 = vst [vmem:[%s2323_s6 + $0x38] sm:$0xff] %v1593_v52  }
 0x195   : > { %v953_v15 = vpop.f32.mrf.mxu3 }
 0x196   : > { %v1194_v24 = vmax.f32 %v953_v15, 1.0 }
 0x197   : > { %v2333_v57 = vpop.f32.mrf.mxu2  ;;  %v837_v16 = vpop.f32.mrf.mxu0 }
 0x198   : > { %v1209_v22 = vmul.f32 %v2313_v58, %v837_v16  ;;  %v933_v23 = vpop.f32.mrf.mxu1  ;;  %1839 = vrcp.f32 %v1194_v24 }
 0x19a   : > { %v1568_v25 = vpack.c.bf16 %v1209_v22, %v1208_v21 }
 0x19c   : > { %1676 = vst [vmem:[%s2323_s6 + $0x10] sm:$0xff] %v1568_v25  }
 0x19d   : > { %v955_v55 = vpop.f32.mrf.mxu3 }
 0x19e   : > { %v1195_v1 = vmax.f32 %v955_v55, 1.0  ;;  %v2340_v30 = vpop.eup %1839 }
 0x19f   : > { %v2338_v27 = vpop.f32.mrf.mxu2  ;;  %v840_v28 = vpop.f32.mrf.mxu0  ;;  %v1220_v35 = vmul.f32 %v2340_v30, %v923_v32  ;;  %v1222_v13 = vmul.f32 %v2340_v30, %v928_v3  ;;  %v1232_v17 = vmul.f32 %v2340_v30, %v953_v15  ;;  %v1224_v40 = vmul.f32 %v2340_v30, %v933_v23 }
 0x1a0   : > { %1841 = vrcp.f32 %v1195_v1  ;;  %v935_v29 = vpop.f32.mrf.mxu1  ;;  %v1210_v44 = vmul.f32 %v2309_v9, %v840_v28 }
 0x1a5   : > { %v958_v31 = vpop.f32.mrf.mxu3 }
 0x1a6   : > { %v2342_v34 = vpop.eup %1841  ;;  %v1234_v32 = vmul.f32 %v2340_v30, %v958_v31 }
 0x1a7   : > { %v1221_v36 = vmul.f32 %v2342_v34, %v925_v53  ;;  %v1223_v37 = vmul.f32 %v2342_v34, %v930_v14  ;;  %v1233_v38 = vmul.f32 %v2342_v34, %v955_v55  ;;  %v1225_v39 = vmul.f32 %v2342_v34, %v935_v29  ;;  %v1081_v51 = vpop.f32.mrf.mxu2  ;;  %v842_v54 = vpop.f32.mrf.mxu0 }
 0x1a8   : > { %v1211_v41 = vmul.f32 %v2313_v58, %v842_v54  ;;  %v938_v33 = vpop.f32.mrf.mxu1 }
 0x1a9   : > { %v1598_v42 = vpack.c.bf16 %v1221_v36, %v1220_v35  ;;  %v1603_v0 = vpack.c.bf16 %v1223_v37, %v1222_v13  ;;  %v1628_v43 = vpack.c.bf16 %v1233_v38, %v1232_v17  ;;  %v1608_v45 = vpack.c.bf16 %v1225_v39, %v1224_v40 }
 0x1aa   : > { %v1573_v46 = vpack.c.bf16 %v1211_v41, %v1210_v44  ;;  %v1226_v56 = vmul.f32 %v2340_v30, %v938_v33 }
 0x1ab   : > { %1682 = vst [vmem:[%s2323_s6 + $0x40] sm:$0xff] %v1598_v42  }
 0x1ac   : > { %1683 = vst [vmem:[%s2323_s6 + $0x48] sm:$0xff] %v1603_v0  }
 0x1ad   : > { %1688 = vst [vmem:[%s2323_s6 + $0x70] sm:$0xff] %v1628_v43   ;;  %v960_v6 = vpop.f32.mrf.mxu3 }
 0x1ae   : > { %1684 = vst [vmem:[%s2323_s6 + $0x50] sm:$0xff] %v1608_v45   ;;  %v1235_v19 = vmul.f32 %v2342_v34, %v960_v6 }
 0x1af   : > { %1677 = vst [vmem:[%s2323_s6 + $0x18] sm:$0xff] %v1573_v46   ;;  %v1084_v47 = vpop.f32.mrf.mxu2  ;;  %v845_v20 = vpop.f32.mrf.mxu0 }
 0x1b0   : > { %v1633_v50 = vpack.c.bf16 %v1235_v19, %v1234_v32  ;;  %v940_v53 = vpop.f32.mrf.mxu1  ;;  %v1212_v63 = vmul.f32 %v2309_v9, %v845_v20 }
 0x1b1   : > { %v1227_v59 = vmul.f32 %v2342_v34, %v940_v53 }
 0x1b2   : > { %1689 = vst [vmem:[%s2323_s6 + $0x78] sm:$0xff] %v1633_v50  }
 0x1b3   : > { %v1613_v18 = vpack.c.bf16 %v1227_v59, %v1226_v56 }
 0x1b5   : > { %1685 = vst [vmem:[%s2323_s6 + $0x58] sm:$0xff] %v1613_v18   ;;  %v1099_v60 = vpop.f32.mrf.mxu3 }
 0x1b6   : > { %v1196_v49 = vmax.f32 %v1099_v60, 1.0 }
 0x1b7   : > { %v1086_v61 = vpop.f32.mrf.mxu2  ;;  %v847_v26 = vpop.f32.mrf.mxu0 }
 0x1b8   : > { %v1213_v2 = vmul.f32 %v2313_v58, %v847_v26  ;;  %v943_v3 = vpop.f32.mrf.mxu1  ;;  %1843 = vrcp.f32 %v1196_v49 }
 0x1b9   : > { %v1228_v52 = vmul.f32 %v2340_v30, %v943_v3 }
 0x1ba   : > { %v1578_v4 = vpack.c.bf16 %v1213_v2, %v1212_v63 }
 0x1bc   : > { %1678 = vst [vmem:[%s2323_s6 + $0x20] sm:$0xff] %v1578_v4  }
 0x1bd   : > { %v1101_v7 = vpop.f32.mrf.mxu3 }
 0x1be   : > { %v1197_v8 = vmax.f32 %v1101_v7, 1.0  ;;  %v1844_v15 = vpop.eup %1843 }
 0x1bf   : > { %v1089_v5 = vpop.f32.mrf.mxu2  ;;  %v850_v10 = vpop.f32.mrf.mxu0  ;;  %v1236_v23 = vmul.f32 %v1844_v15, %v2306_v48  ;;  %v1238_v24 = vmul.f32 %v1844_v15, %v2330_v11  ;;  %v1240_v25 = vmul.f32 %v1844_v15, %v2338_v27  ;;  %v1242_v13 = vmul.f32 %v1844_v15, %v1084_v47 }
 0x1c0   : > { %1845 = vrcp.f32 %v1197_v8  ;;  %v945_v12 = vpop.f32.mrf.mxu1  ;;  %v1248_v17 = vmul.f32 %v1844_v15, %v1099_v60  ;;  %v1244_v39 = vmul.f32 %v1844_v15, %v1089_v5  ;;  %v1214_v54 = vmul.f32 %v2309_v9, %v850_v10 }
 0x1c1   : > { %v1229_v14 = vmul.f32 %v2342_v34, %v945_v12 }
 0x1c3   : > { %v1618_v16 = vpack.c.bf16 %v1229_v14, %v1228_v52 }
 0x1c5   : > { %1686 = vst [vmem:[%s2323_s6 + $0x60] sm:$0xff] %v1618_v16   ;;  %v1104_v21 = vpop.f32.mrf.mxu3 }
 0x1c6   : > { %v1846_v22 = vpop.eup %1845  ;;  %v1250_v42 = vmul.f32 %v1844_v15, %v1104_v21 }
 0x1c7   : > { %v1237_v55 = vmul.f32 %v1846_v22, %v2320_v62  ;;  %v1239_v1 = vmul.f32 %v1846_v22, %v2333_v57  ;;  %v1241_v28 = vmul.f32 %v1846_v22, %v1081_v51  ;;  %v1243_v29 = vmul.f32 %v1846_v22, %v1086_v61  ;;  %v1091_v31 = vpop.f32.mrf.mxu2  ;;  %v852_v35 = vpop.f32.mrf.mxu0 }
 0x1c8   : > { %v1249_v36 = vmul.f32 %v1846_v22, %v1101_v7  ;;  %v1245_v37 = vmul.f32 %v1846_v22, %v1091_v31  ;;  %v948_v48 = vpop.f32.mrf.mxu1  ;;  %v1215_v62 = vmul.f32 %v2313_v58, %v852_v35 }
 0x1c9   : > { %v1638_v11 = vpack.c.bf16 %v1237_v55, %v1236_v23  ;;  %v1643_v38 = vpack.c.bf16 %v1239_v1, %v1238_v24  ;;  %v1648_v27 = vpack.c.bf16 %v1241_v28, %v1240_v25  ;;  %v1653_v57 = vpack.c.bf16 %v1243_v29, %v1242_v13 }
 0x1ca   : > { %v1668_v51 = vpack.c.bf16 %v1249_v36, %v1248_v17  ;;  %v1658_v40 = vpack.c.bf16 %v1245_v37, %v1244_v39  ;;  %v1583_v41 = vpack.c.bf16 %v1215_v62, %v1214_v54  ;;  %v1230_v9 = vmul.f32 %v2340_v30, %v948_v48 }
 0x1cb   : > { %1690 = vst [vmem:[%s2323_s6 + $0x80] sm:$0xff] %v1638_v11  }
 0x1cc   : > { %1691 = vst [vmem:[%s2323_s6 + $0x88] sm:$0xff] %v1643_v38  }
 0x1cd   : > { %1692 = vst [vmem:[%s2323_s6 + $0x90] sm:$0xff] %v1648_v27   ;;  %v1106_v33 = vpop.f32.mrf.mxu3 }
 0x1ce   : > { %1693 = vst [vmem:[%s2323_s6 + $0x98] sm:$0xff] %v1653_v57   ;;  %v1251_v58 = vmul.f32 %v1846_v22, %v1106_v33 }
 0x1cf   : > { %1696 = vst [vmem:[%s2323_s6 + $0xb0] sm:$0xff] %v1668_v51   ;;  %v1094_v0 = vpop.f32.mrf.mxu2 }
 0x1d0   : > { %1694 = vst [vmem:[%s2323_s6 + $0xa0] sm:$0xff] %v1658_v40   ;;  %v1673_v43 = vpack.c.bf16 %v1251_v58, %v1250_v42  ;;  %v950_v44 = vpop.f32.mrf.mxu1  ;;  %v1246_v32 = vmul.f32 %v1844_v15, %v1094_v0 }
 0x1d1   : > { %1679 = vst [vmem:[%s2323_s6 + $0x28] sm:$0xff] %v1583_v41   ;;  %v1231_v45 = vmul.f32 %v2342_v34, %v950_v44 }
 0x1d2   : > { %1697 = vst [vmem:[%s2323_s6 + $0xb8] sm:$0xff] %v1673_v43  }
 0x1d3   : > { %v1623_v46 = vpack.c.bf16 %v1231_v45, %v1230_v9 }
 0x1d5   : > { %1687 = vst [vmem:[%s2323_s6 + $0x68] sm:$0xff] %v1623_v46  }
 0x1d7   : > { %v1096_v6 = vpop.f32.mrf.mxu2 }
 0x1d8   : > { %v1247_v19 = vmul.f32 %v1846_v22, %v1096_v6 }
 0x1da   : > { %v1663_v47 = vpack.c.bf16 %v1247_v19, %v1246_v32 }
 0x1dc   : > { %1695 = vst [vmem:[%s2323_s6 + $0xa8] sm:$0xff] %v1663_v47  }
 0x1dd   : > { %1874 = shalt.err (!%p1871_p5)
}
 0x1de   : > { %s1931_s30 = smov 64   ;;  %s1932_s3 = smov 4  }
 0x1df   : > { %1758 = dma.vmem_to_hbm [thread:$0]  (%p1988_p4), %s1362_s18, 3072, %s1364_s20, %s1349_s12, %s1931_s30, %s1931_s30, %s1932_s3  }
 0x1e0 PF: > { %p1764_p6 = scmp.ge.s32.totalorder %s1925_s14, 2  ;;  %s1378_s4 = sand.u32 1, %s1905_s9  }
 0x1e1   : > { %s1379_s5 = scalar_lea.sflag [#allocation4], %s1378_s4 }
 0x1e2   : > { %p1761_p7 = pnand %p1764_p6, %p1995_p8 }
 0x1e4   : > { %p1762_p9 = pneg %p1761_p7 }
 0x1e6   : > { %1900 = dma.done.wait (%p1762_p9), %s1379_s5, 3072  }
 0x1e7   : > { %1902 = vsyncadd (%p1762_p9), %s1379_s5, 4294964224  ;;  %s15_s14 = sadd.s32 1, %s1925_s14   ;;  %s2450_s9 = smov %s1909_s10 }
 0x1e8   : > { %p12_p10 = scmp.ge.s32.totalorder %s15_s14, 4   ;;  %s2451_s10 = smov %s1913_s11 }
 0x1e9   : > { %s2452_s11 = smov %s2001_s22  ;;  %s2453_s12 = smov %s1921_s13 }
 0x1ea   : > { %s2454_s13 = smov %s2456_s17  ;;  %14 = sbr.rel (!%p12_p10) target bundleno = 4 (0x4), region = 76 }
 0x1ef   :  { %1385 = vsyncpa [#allocation4], 1 }
 0x1f0   :  { %1387 = vsyncpa [#allocation4 + $0x1], 1 }

</bundles_post_ra>
